<compile_context>
chip_gen: v5e
topology: v5e:2x2
jax: 0.10.0
libtpu: 0.0.40
codegen_flags: <defaults>
</compile_context>

<pallas_src>
import functools

import jax
import jax.numpy as jnp
from jax.experimental import pallas as pl
from jax.experimental.pallas import tpu as pltpu


# Order in which the preprocessed parameters are passed to the kernel.
_W_ORDER = ("w1x", "w1y", "b1", "w2", "b2", "w3", "b3",
            "w4z", "w4x", "b4", "w5", "b5", "w6", "b6")


def _cvae_kernel(
    x_ref, y_ref, eps_ref,
    w1x_ref, w1y_ref, b1_ref,
    w2_ref, b2_ref,
    w3_ref, b3_ref,              # fused fc31|fc32: (h2, 2*z), (1, 2*z)
    w4z_ref, w4x_ref, b4_ref,
    w5_ref, b5_ref,
    w6_ref, b6_ref,
    recon_ref, ml_ref,           # ml = packed [mu | log_var], lane-dense (TB, 2*z)
):
    f32 = jnp.float32
    cdt = w2_ref.dtype            # matmul-operand dtype (bf16); accumulation is f32

    x = x_ref[...].astype(cdt)
    y = y_ref[...].astype(cdt)

    # ---- encoder ----
    # h1 = relu(cat(x, y) @ W1.T + b1), concat folded into two matmuls.
    h1 = jnp.dot(x, w1x_ref[...], preferred_element_type=f32)
    h1 = h1 + jnp.dot(y, w1y_ref[...], preferred_element_type=f32)
    h1 = jnp.maximum(h1 + b1_ref[...], 0.0)

    h2 = jnp.dot(h1.astype(cdt), w2_ref[...], preferred_element_type=f32) + b2_ref[...]
    h2 = jnp.maximum(h2, 0.0)

    # fc31 / fc32 fused into a single 128-wide matmul; store packed (lane-dense).
    ml = jnp.dot(h2.astype(cdt), w3_ref[...], preferred_element_type=f32) + b3_ref[...]
    ml_ref[...] = ml

    # ---- reparameterization (f32 elementwise; exp lands on the EUP) ----
    z_dim = eps_ref.shape[-1]
    mu = ml[:, :z_dim]
    log_var = ml[:, z_dim:]
    std = jnp.exp(0.5 * log_var)
    z = eps_ref[...] * std + mu

    # ---- decoder ----
    # h4 = relu(cat(z, x) @ W4.T + b4)
    h4 = jnp.dot(z.astype(cdt), w4z_ref[...], preferred_element_type=f32)
    h4 = h4 + jnp.dot(x, w4x_ref[...], preferred_element_type=f32)
    h4 = jnp.maximum(h4 + b4_ref[...], 0.0)

    h5 = jnp.dot(h4.astype(cdt), w5_ref[...], preferred_element_type=f32) + b5_ref[...]
    h5 = jnp.maximum(h5, 0.0)

    # recon = h5 @ W6.T + b6  (no final activation, matches the module)
    recon_ref[...] = (jnp.dot(h5.astype(cdt), w6_ref[...], preferred_element_type=f32)
                      + b6_ref[...])


def init_cvae_params(key, x_dim, h_dim1, h_dim2, z_dim):
    """Deterministic synthetic parameters in PyTorch Linear shapes (out, in)."""
    y_dim = 784 - x_dim
    shapes = {
        "fc1": (h_dim1, x_dim + y_dim),
        "fc2": (h_dim2, h_dim1),
        "fc31": (z_dim, h_dim2),
        "fc32": (z_dim, h_dim2),
        "fc4": (h_dim2, z_dim + x_dim),
        "fc5": (h_dim1, h_dim2),
        "fc6": (y_dim, h_dim1),
    }
    params = {}
    for name, (out_f, in_f) in shapes.items():
        key, kw, kb = jax.random.split(key, 3)
        bound = 1.0 / jnp.sqrt(in_f)
        params[name + "_w"] = jax.random.uniform(
            kw, (out_f, in_f), jnp.float32, -bound, bound)
        params[name + "_b"] = jax.random.uniform(
            kb, (out_f,), jnp.float32, -bound, bound)
    return params


def prepare_cvae_params(params, x_dim, z_dim, weight_dtype=jnp.bfloat16):
    """One-time offline preprocessing: (in,out) layout, pre-split concat layers,
    fused fc31|fc32, bf16 weights (biases stay f32 and are added post-accumulate)."""
    def wT(w):
        return jnp.asarray(w.T, weight_dtype)

    def bias(b):
        return jnp.asarray(b.reshape(1, -1), jnp.float32)

    w1 = params["fc1_w"]                     # (h1, x_dim + y_dim)
    w4 = params["fc4_w"]                     # (h2, z_dim + x_dim)
    prep = {
        "w1x": wT(w1[:, :x_dim]),            # (x_dim, h1)
        "w1y": wT(w1[:, x_dim:]),            # (y_dim, h1)
        "b1": bias(params["fc1_b"]),
        "w2": wT(params["fc2_w"]),
        "b2": bias(params["fc2_b"]),
        "w3": jnp.concatenate([wT(params["fc31_w"]), wT(params["fc32_w"])], axis=1),
        "b3": jnp.concatenate([bias(params["fc31_b"]), bias(params["fc32_b"])], axis=1),
        "w4z": wT(w4[:, :z_dim]),            # (z_dim, h2)
        "w4x": wT(w4[:, z_dim:]),            # (x_dim, h2)
        "b4": bias(params["fc4_b"]),
        "w5": wT(params["fc5_w"]),
        "b5": bias(params["fc5_b"]),
        "w6": wT(params["fc6_w"]),
        "b6": bias(params["fc6_b"]),
    }
    return prep


def _round_up(n, m):
    return ((n + m - 1) // m) * m


@functools.partial(jax.jit, static_argnames=("batch_tile",))
def cvae_forward(prep, x, y, eps, *, batch_tile=None):
    """Full CVAE forward pass in one batch-tiled Pallas kernel.

    Args:
      prep: output of prepare_cvae_params (preprocessed, bf16 weights).
      x:   [B, x_dim] f32, y: [B, 784-x_dim] f32, eps: [B, z_dim] f32 noise.
    Returns:
      (recon [B, 784-x_dim], mu [B, z_dim], log_var [B, z_dim]) in f32.
    """
    B, x_dim = x.shape
    y_dim = y.shape[1]
    z_dim = eps.shape[1]
    h_dim1 = prep["w1x"].shape[1]
    h_dim2 = prep["w2"].shape[1]

    # Batch tile: fill MXU rows when the batch allows (256 on v6e/v7x); keep it a
    # multiple of 8 (sublane) always.
    if batch_tile is None:
        tb = min(256, _round_up(B, 8))
    else:
        tb = int(batch_tile)
    if tb % 8 != 0:
        raise ValueError("batch_tile must be a multiple of 8")

    b_pad = _round_up(B, tb)
    if b_pad != B:
        pad = ((0, b_pad - B), (0, 0))
        x = jnp.pad(x, pad)
        y = jnp.pad(y, pad)
        eps = jnp.pad(eps, pad)

    grid = (b_pad // tb,)
    act_map = lambda i: (i, 0)      # batch-tiled activations / outputs
    fixed_map = lambda i: (0, 0)    # weights stay VMEM-resident across the grid

    in_specs = [
        pl.BlockSpec((tb, x_dim), act_map),
        pl.BlockSpec((tb, y_dim), act_map),
        pl.BlockSpec((tb, z_dim), act_map),
    ] + [pl.BlockSpec(prep[k].shape, fixed_map) for k in _W_ORDER]

    out_specs = (
        pl.BlockSpec((tb, y_dim), act_map),        # recon
        pl.BlockSpec((tb, 2 * z_dim), act_map),    # packed [mu | log_var], lane-dense
    )

    # Advisory cost estimate (the kernel is weight-traffic bound at small B).
    flops = 2 * b_pad * ((x_dim + y_dim) * h_dim1 + h_dim1 * h_dim2
                         + h_dim2 * 2 * z_dim + (z_dim + x_dim) * h_dim2
                         + h_dim2 * h_dim1 + h_dim1 * y_dim)
    weight_bytes = sum(int(prep[k].size) * prep[k].dtype.itemsize for k in _W_ORDER)
    bytes_accessed = (weight_bytes
                      + b_pad * (x_dim + y_dim + z_dim) * 4
                      + b_pad * (y_dim + 2 * z_dim) * 4)
    cost = pl.CostEstimate(flops=flops, transcendentals=b_pad * z_dim,
                           bytes_accessed=bytes_accessed)

    recon, ml = pl.pallas_call(
        _cvae_kernel,
        grid=grid,
        out_shape=(
            jax.ShapeDtypeStruct((b_pad, y_dim), jnp.float32),
            jax.ShapeDtypeStruct((b_pad, 2 * z_dim), jnp.float32),
        ),
        in_specs=in_specs,
        out_specs=out_specs,
        compiler_params=pltpu.CompilerParams(
            dimension_semantics=("parallel",),
            vmem_limit_bytes=16 << 20,
        ),
        cost_estimate=cost,
    )(x, y, eps, *[prep[k] for k in _W_ORDER])

    recon = recon[:B]
    mu = ml[:B, :z_dim]
    log_var = ml[:B, z_dim:]
    return recon, mu, log_var


def cvae_forward_ref_prepared(prep, x, y, eps):
    """Pure-JAX mirror of the kernel math (same bf16 weights / operand casts)."""
    f32 = jnp.float32
    cdt = prep["w2"].dtype

    def mm(h, w):
        return jnp.dot(h.astype(cdt), w, preferred_element_type=f32)

    h = jnp.maximum(mm(x, prep["w1x"]) + mm(y, prep["w1y"]) + prep["b1"], 0.0)
    h = jnp.maximum(mm(h, prep["w2"]) + prep["b2"], 0.0)
    ml = mm(h, prep["w3"]) + prep["b3"]
    z_dim = eps.shape[-1]
    mu, log_var = ml[:, :z_dim], ml[:, z_dim:]
    z = eps * jnp.exp(0.5 * log_var) + mu
    h = jnp.maximum(mm(z, prep["w4z"]) + mm(x, prep["w4x"]) + prep["b4"], 0.0)
    h = jnp.maximum(mm(h, prep["w5"]) + prep["b5"], 0.0)
    recon = mm(h, prep["w6"]) + prep["b6"]
    return recon, mu, log_var


def cvae_forward_ref_f32(params, x, y, eps):
    """Pure-f32 reference mirroring the PyTorch module exactly."""
    def lin(n, h):
        return h @ params[n + "_w"].T + params[n + "_b"]

    h = jnp.concatenate([x, y], axis=-1)
    h = jax.nn.relu(lin("fc1", h))
    h = jax.nn.relu(lin("fc2", h))
    mu, log_var = lin("fc31", h), lin("fc32", h)
    z = eps * jnp.exp(0.5 * log_var) + mu
    h = jnp.concatenate([z, x], axis=-1)
    h = jax.nn.relu(lin("fc4", h))
    h = jax.nn.relu(lin("fc5", h))
    return lin("fc6", h), mu, log_var


if __name__ == "__main__":
    # Small dims consistent with the module: y_dim = 784 - x_dim.
    B, X_DIM, H1, H2, Z = 32, 128, 256, 128, 64
    Y_DIM = 784 - X_DIM

    root = jax.random.PRNGKey(0)
    k_params, k_x, k_y, k_eps = jax.random.split(root, 4)

    params = init_cvae_params(k_params, X_DIM, H1, H2, Z)
    prep = prepare_cvae_params(params, X_DIM, Z)   # one-time offline preprocessing

    x = jax.random.normal(k_x, (B, X_DIM), jnp.float32)
    y = jax.random.normal(k_y, (B, Y_DIM), jnp.float32)
    eps = jax.random.normal(k_eps, (B, Z), jnp.float32)

    # Multi-step batch grid (grid=(4,)), weights resident across iterations.
    recon, mu, log_var = cvae_forward(prep, x, y, eps, batch_tile=8)
    jax.block_until_ready((recon, mu, log_var))
    assert recon.shape == (B, Y_DIM) and mu.shape == (B, Z) and log_var.shape == (B, Z)

    # Tight check against a pure-JAX mirror of the kernel math (same bf16 weights).
    r_m, mu_m, lv_m = cvae_forward_ref_prepared(prep, x, y, eps)
    assert jnp.allclose(recon, r_m, atol=2e-3, rtol=2e-3)
    assert jnp.allclose(mu, mu_m, atol=2e-3, rtol=2e-3)
    assert jnp.allclose(log_var, lv_m, atol=2e-3, rtol=2e-3)

    # Loose check against the exact f32 module math (bf16 weight quantization).
    r_f, mu_f, lv_f = cvae_forward_ref_f32(params, x, y, eps)
    assert jnp.allclose(recon, r_f, atol=5e-2, rtol=5e-2)
    assert jnp.allclose(mu, mu_f, atol=5e-2, rtol=5e-2)
    assert jnp.allclose(log_var, lv_f, atol=5e-2, rtol=5e-2)

    # Exercise the padded-batch path (B=20 -> tile 24, 4 padded rows sliced off).
    Bp = 20
    rp, mup, lvp = cvae_forward(prep, x[:Bp], y[:Bp], eps[:Bp])
    jax.block_until_ready((rp, mup, lvp))
    assert rp.shape == (Bp, Y_DIM) and mup.shape == (Bp, Z) and lvp.shape == (Bp, Z)
    assert jnp.allclose(rp, r_m[:Bp], atol=2e-3, rtol=2e-3)
    assert jnp.allclose(mup, mu_m[:Bp], atol=2e-3, rtol=2e-3)
    assert jnp.allclose(lvp, lv_m[:Bp], atol=2e-3, rtol=2e-3)

    print("KERNEL_OK")
</pallas_src>

<mosaic_0001>
module attributes {stable_mosaic.version = 11 : i64} {
  func.func @_cvae_kernel(%arg0: i32, %arg1: memref<8x128xf32, #tpu.memory_space<vmem>>, %arg2: memref<8x656xf32, #tpu.memory_space<vmem>>, %arg3: memref<8x64xf32, #tpu.memory_space<vmem>>, %arg4: memref<128x256xbf16, #tpu.memory_space<vmem>>, %arg5: memref<656x256xbf16, #tpu.memory_space<vmem>>, %arg6: memref<1x256xf32, #tpu.memory_space<vmem>>, %arg7: memref<256x128xbf16, #tpu.memory_space<vmem>>, %arg8: memref<1x128xf32, #tpu.memory_space<vmem>>, %arg9: memref<128x128xbf16, #tpu.memory_space<vmem>>, %arg10: memref<1x128xf32, #tpu.memory_space<vmem>>, %arg11: memref<64x128xbf16, #tpu.memory_space<vmem>>, %arg12: memref<128x128xbf16, #tpu.memory_space<vmem>>, %arg13: memref<1x128xf32, #tpu.memory_space<vmem>>, %arg14: memref<128x256xbf16, #tpu.memory_space<vmem>>, %arg15: memref<1x256xf32, #tpu.memory_space<vmem>>, %arg16: memref<256x656xbf16, #tpu.memory_space<vmem>>, %arg17: memref<1x656xf32, #tpu.memory_space<vmem>>, %arg18: memref<8x656xf32, #tpu.memory_space<vmem>>, %arg19: memref<8x128xf32, #tpu.memory_space<vmem>>) attributes {dimension_semantics = [#tpu.dimension_semantics<parallel>], iteration_bounds = array<i64: 4>, scalar_prefetch = 0 : i64, scratch_operands = 0 : i64, tpu.core_type = #tpu.core_type<tc>, window_params = [{transform_indices = @transform_0, window_bounds = array<i64: 8, 128>}, {transform_indices = @transform_1, window_bounds = array<i64: 8, 656>}, {transform_indices = @transform_2, window_bounds = array<i64: 8, 64>}, {pipeline_mode = #tpu.pipeline_mode<synchronous>, transform_indices = @transform_3, window_bounds = array<i64: 128, 256>}, {pipeline_mode = #tpu.pipeline_mode<synchronous>, transform_indices = @transform_4, window_bounds = array<i64: 656, 256>}, {pipeline_mode = #tpu.pipeline_mode<synchronous>, transform_indices = @transform_5, window_bounds = array<i64: 1, 256>}, {pipeline_mode = #tpu.pipeline_mode<synchronous>, transform_indices = @transform_6, window_bounds = array<i64: 256, 128>}, {pipeline_mode = #tpu.pipeline_mode<synchronous>, transform_indices = @transform_7, window_bounds = array<i64: 1, 128>}, {pipeline_mode = #tpu.pipeline_mode<synchronous>, transform_indices = @transform_8, window_bounds = array<i64: 128, 128>}, {pipeline_mode = #tpu.pipeline_mode<synchronous>, transform_indices = @transform_9, window_bounds = array<i64: 1, 128>}, {pipeline_mode = #tpu.pipeline_mode<synchronous>, transform_indices = @transform_10, window_bounds = array<i64: 64, 128>}, {pipeline_mode = #tpu.pipeline_mode<synchronous>, transform_indices = @transform_11, window_bounds = array<i64: 128, 128>}, {pipeline_mode = #tpu.pipeline_mode<synchronous>, transform_indices = @transform_12, window_bounds = array<i64: 1, 128>}, {pipeline_mode = #tpu.pipeline_mode<synchronous>, transform_indices = @transform_13, window_bounds = array<i64: 128, 256>}, {pipeline_mode = #tpu.pipeline_mode<synchronous>, transform_indices = @transform_14, window_bounds = array<i64: 1, 256>}, {pipeline_mode = #tpu.pipeline_mode<synchronous>, transform_indices = @transform_15, window_bounds = array<i64: 256, 656>}, {pipeline_mode = #tpu.pipeline_mode<synchronous>, transform_indices = @transform_16, window_bounds = array<i64: 1, 656>}, {transform_indices = @transform_17, window_bounds = array<i64: 8, 656>}, {transform_indices = @transform_18, window_bounds = array<i64: 8, 128>}]} {
    %c0 = arith.constant 0 : index
    %c0_0 = arith.constant 0 : index
    %0 = vector.load %arg1[%c0, %c0_0] : memref<8x128xf32, #tpu.memory_space<vmem>>, vector<8x128xf32>
    %1 = arith.truncf %0 : vector<8x128xf32> to vector<8x128xbf16>
    %c0_1 = arith.constant 0 : index
    %c0_2 = arith.constant 0 : index
    %2 = vector.load %arg2[%c0_1, %c0_2] : memref<8x656xf32, #tpu.memory_space<vmem>>, vector<8x656xf32>
    %3 = arith.truncf %2 : vector<8x656xf32> to vector<8x656xbf16>
    %c0_3 = arith.constant 0 : index
    %c0_4 = arith.constant 0 : index
    %4 = vector.load %arg4[%c0_3, %c0_4] : memref<128x256xbf16, #tpu.memory_space<vmem>>, vector<128x256xbf16>
    %cst = arith.constant dense<0.000000e+00> : vector<8x256xf32>
    %5 = tpu.matmul %1, %4, %cst {dimension_numbers = #tpu.dot_dimension_numbers<[1], [0], [0], [1], [0, 0, 1, 1], [], []>} : vector<8x128xbf16>, vector<128x256xbf16>, vector<8x256xf32> -> vector<8x256xf32>
    %c0_5 = arith.constant 0 : index
    %c0_6 = arith.constant 0 : index
    %6 = vector.load %arg5[%c0_5, %c0_6] : memref<656x256xbf16, #tpu.memory_space<vmem>>, vector<656x256xbf16>
    %cst_7 = arith.constant dense<0.000000e+00> : vector<8x256xf32>
    %7 = tpu.matmul %3, %6, %cst_7 {dimension_numbers = #tpu.dot_dimension_numbers<[1], [0], [0], [1], [0, 0, 1, 1], [], []>} : vector<8x656xbf16>, vector<656x256xbf16>, vector<8x256xf32> -> vector<8x256xf32>
    %8 = arith.addf %5, %7 : vector<8x256xf32>
    %c0_8 = arith.constant 0 : index
    %c0_9 = arith.constant 0 : index
    %9 = vector.load %arg6[%c0_8, %c0_9] : memref<1x256xf32, #tpu.memory_space<vmem>>, vector<1x256xf32>
    %10 = vector.broadcast %9 : vector<1x256xf32> to vector<8x256xf32>
    %11 = arith.addf %8, %10 : vector<8x256xf32>
    %cst_10 = arith.constant 0.000000e+00 : f32
    %12 = vector.broadcast %cst_10 : f32 to vector<8x256xf32>
    %13 = arith.maximumf %11, %12 : vector<8x256xf32>
    %14 = arith.truncf %13 : vector<8x256xf32> to vector<8x256xbf16>
    %c0_11 = arith.constant 0 : index
    %c0_12 = arith.constant 0 : index
    %15 = vector.load %arg7[%c0_11, %c0_12] : memref<256x128xbf16, #tpu.memory_space<vmem>>, vector<256x128xbf16>
    %cst_13 = arith.constant dense<0.000000e+00> : vector<8x128xf32>
    %16 = tpu.matmul %14, %15, %cst_13 {dimension_numbers = #tpu.dot_dimension_numbers<[1], [0], [0], [1], [0, 0, 1, 1], [], []>} : vector<8x256xbf16>, vector<256x128xbf16>, vector<8x128xf32> -> vector<8x128xf32>
    %c0_14 = arith.constant 0 : index
    %c0_15 = arith.constant 0 : index
    %17 = vector.load %arg8[%c0_14, %c0_15] : memref<1x128xf32, #tpu.memory_space<vmem>>, vector<1x128xf32>
    %18 = vector.broadcast %17 : vector<1x128xf32> to vector<8x128xf32>
    %19 = arith.addf %16, %18 : vector<8x128xf32>
    %cst_16 = arith.constant 0.000000e+00 : f32
    %20 = vector.broadcast %cst_16 : f32 to vector<8x128xf32>
    %21 = arith.maximumf %19, %20 : vector<8x128xf32>
    %22 = arith.truncf %21 : vector<8x128xf32> to vector<8x128xbf16>
    %c0_17 = arith.constant 0 : index
    %c0_18 = arith.constant 0 : index
    %23 = vector.load %arg9[%c0_17, %c0_18] : memref<128x128xbf16, #tpu.memory_space<vmem>>, vector<128x128xbf16>
    %cst_19 = arith.constant dense<0.000000e+00> : vector<8x128xf32>
    %24 = tpu.matmul %22, %23, %cst_19 {dimension_numbers = #tpu.dot_dimension_numbers<[1], [0], [0], [1], [0, 0, 1, 1], [], []>} : vector<8x128xbf16>, vector<128x128xbf16>, vector<8x128xf32> -> vector<8x128xf32>
    %c0_20 = arith.constant 0 : index
    %c0_21 = arith.constant 0 : index
    %25 = vector.load %arg10[%c0_20, %c0_21] : memref<1x128xf32, #tpu.memory_space<vmem>>, vector<1x128xf32>
    %26 = vector.broadcast %25 : vector<1x128xf32> to vector<8x128xf32>
    %27 = arith.addf %24, %26 : vector<8x128xf32>
    %c0_22 = arith.constant 0 : index
    %c0_23 = arith.constant 0 : index
    %28 = vector.load %arg19[%c0_22, %c0_23] : memref<8x128xf32, #tpu.memory_space<vmem>>, vector<8x128xf32>
    tpu.vector_store %arg19[%c0_22, %c0_23], %27 {strides = array<i32>} : memref<8x128xf32, #tpu.memory_space<vmem>>, vector<8x128xf32>,
    %29 = vector.extract_strided_slice %27 {offsets = [0, 0], sizes = [8, 64], strides = [1, 1]} : vector<8x128xf32> to vector<8x64xf32>
    %30 = vector.extract_strided_slice %27 {offsets = [0, 64], sizes = [8, 64], strides = [1, 1]} : vector<8x128xf32> to vector<8x64xf32>
    %cst_24 = arith.constant 5.000000e-01 : f32
    %31 = vector.broadcast %cst_24 : f32 to vector<8x64xf32>
    %32 = arith.mulf %31, %30 : vector<8x64xf32>
    %33 = math.exp %32 : vector<8x64xf32>
    %c0_25 = arith.constant 0 : index
    %c0_26 = arith.constant 0 : index
    %34 = vector.load %arg3[%c0_25, %c0_26] : memref<8x64xf32, #tpu.memory_space<vmem>>, vector<8x64xf32>
    %35 = arith.mulf %34, %33 : vector<8x64xf32>
    %36 = arith.addf %35, %29 : vector<8x64xf32>
    %37 = arith.truncf %36 : vector<8x64xf32> to vector<8x64xbf16>
    %c0_27 = arith.constant 0 : index
    %c0_28 = arith.constant 0 : index
    %38 = vector.load %arg11[%c0_27, %c0_28] : memref<64x128xbf16, #tpu.memory_space<vmem>>, vector<64x128xbf16>
    %cst_29 = arith.constant dense<0.000000e+00> : vector<8x128xf32>
    %39 = tpu.matmul %37, %38, %cst_29 {dimension_numbers = #tpu.dot_dimension_numbers<[1], [0], [0], [1], [0, 0, 1, 1], [], []>} : vector<8x64xbf16>, vector<64x128xbf16>, vector<8x128xf32> -> vector<8x128xf32>
    %c0_30 = arith.constant 0 : index
    %c0_31 = arith.constant 0 : index
    %40 = vector.load %arg12[%c0_30, %c0_31] : memref<128x128xbf16, #tpu.memory_space<vmem>>, vector<128x128xbf16>
    %cst_32 = arith.constant dense<0.000000e+00> : vector<8x128xf32>
    %41 = tpu.matmul %1, %40, %cst_32 {dimension_numbers = #tpu.dot_dimension_numbers<[1], [0], [0], [1], [0, 0, 1, 1], [], []>} : vector<8x128xbf16>, vector<128x128xbf16>, vector<8x128xf32> -> vector<8x128xf32>
    %42 = arith.addf %39, %41 : vector<8x128xf32>
    %c0_33 = arith.constant 0 : index
    %c0_34 = arith.constant 0 : index
    %43 = vector.load %arg13[%c0_33, %c0_34] : memref<1x128xf32, #tpu.memory_space<vmem>>, vector<1x128xf32>
    %44 = vector.broadcast %43 : vector<1x128xf32> to vector<8x128xf32>
    %45 = arith.addf %42, %44 : vector<8x128xf32>
    %cst_35 = arith.constant 0.000000e+00 : f32
    %46 = vector.broadcast %cst_35 : f32 to vector<8x128xf32>
    %47 = arith.maximumf %45, %46 : vector<8x128xf32>
    %48 = arith.truncf %47 : vector<8x128xf32> to vector<8x128xbf16>
    %c0_36 = arith.constant 0 : index
    %c0_37 = arith.constant 0 : index
    %49 = vector.load %arg14[%c0_36, %c0_37] : memref<128x256xbf16, #tpu.memory_space<vmem>>, vector<128x256xbf16>
    %cst_38 = arith.constant dense<0.000000e+00> : vector<8x256xf32>
    %50 = tpu.matmul %48, %49, %cst_38 {dimension_numbers = #tpu.dot_dimension_numbers<[1], [0], [0], [1], [0, 0, 1, 1], [], []>} : vector<8x128xbf16>, vector<128x256xbf16>, vector<8x256xf32> -> vector<8x256xf32>
    %c0_39 = arith.constant 0 : index
    %c0_40 = arith.constant 0 : index
    %51 = vector.load %arg15[%c0_39, %c0_40] : memref<1x256xf32, #tpu.memory_space<vmem>>, vector<1x256xf32>
    %52 = vector.broadcast %51 : vector<1x256xf32> to vector<8x256xf32>
    %53 = arith.addf %50, %52 : vector<8x256xf32>
    %cst_41 = arith.constant 0.000000e+00 : f32
    %54 = vector.broadcast %cst_41 : f32 to vector<8x256xf32>
    %55 = arith.maximumf %53, %54 : vector<8x256xf32>
    %56 = arith.truncf %55 : vector<8x256xf32> to vector<8x256xbf16>
    %c0_42 = arith.constant 0 : index
    %c0_43 = arith.constant 0 : index
    %57 = vector.load %arg16[%c0_42, %c0_43] : memref<256x656xbf16, #tpu.memory_space<vmem>>, vector<256x656xbf16>
    %cst_44 = arith.constant dense<0.000000e+00> : vector<8x656xf32>
    %58 = tpu.matmul %56, %57, %cst_44 {dimension_numbers = #tpu.dot_dimension_numbers<[1], [0], [0], [1], [0, 0, 1, 1], [], []>} : vector<8x256xbf16>, vector<256x656xbf16>, vector<8x656xf32> -> vector<8x656xf32>
    %c0_45 = arith.constant 0 : index
    %c0_46 = arith.constant 0 : index
    %59 = vector.load %arg17[%c0_45, %c0_46] : memref<1x656xf32, #tpu.memory_space<vmem>>, vector<1x656xf32>
    %60 = vector.broadcast %59 : vector<1x656xf32> to vector<8x656xf32>
    %61 = arith.addf %58, %60 : vector<8x656xf32>
    %c0_47 = arith.constant 0 : index
    %c0_48 = arith.constant 0 : index
    %62 = vector.load %arg18[%c0_47, %c0_48] : memref<8x656xf32, #tpu.memory_space<vmem>>, vector<8x656xf32>
    tpu.vector_store %arg18[%c0_47, %c0_48], %61 {strides = array<i32>} : memref<8x656xf32, #tpu.memory_space<vmem>>, vector<8x656xf32>,
    return
  }
  func.func @transform_0(%arg0: i32) -> (i32, i32) {
    %c0_i32 = arith.constant 0 : i32
    %c0_i32_0 = arith.constant 0 : i32
    return %arg0, %c0_i32 : i32, i32
  }
  func.func @transform_1(%arg0: i32) -> (i32, i32) {
    %c0_i32 = arith.constant 0 : i32
    %c0_i32_0 = arith.constant 0 : i32
    return %arg0, %c0_i32 : i32, i32
  }
  func.func @transform_2(%arg0: i32) -> (i32, i32) {
    %c0_i32 = arith.constant 0 : i32
    %c0_i32_0 = arith.constant 0 : i32
    return %arg0, %c0_i32 : i32, i32
  }
  func.func @transform_3(%arg0: i32) -> (i32, i32) {
    %c0_i32 = arith.constant 0 : i32
    %c0_i32_0 = arith.constant 0 : i32
    %c0_i32_1 = arith.constant 0 : i32
    return %c0_i32, %c0_i32_0 : i32, i32
  }
  func.func @transform_4(%arg0: i32) -> (i32, i32) {
    %c0_i32 = arith.constant 0 : i32
    %c0_i32_0 = arith.constant 0 : i32
    %c0_i32_1 = arith.constant 0 : i32
    return %c0_i32, %c0_i32_0 : i32, i32
  }
  func.func @transform_5(%arg0: i32) -> (i32, i32) {
    %c0_i32 = arith.constant 0 : i32
    %c0_i32_0 = arith.constant 0 : i32
    %c0_i32_1 = arith.constant 0 : i32
    return %c0_i32, %c0_i32_0 : i32, i32
  }
  func.func @transform_6(%arg0: i32) -> (i32, i32) {
    %c0_i32 = arith.constant 0 : i32
    %c0_i32_0 = arith.constant 0 : i32
    %c0_i32_1 = arith.constant 0 : i32
    return %c0_i32, %c0_i32_0 : i32, i32
  }
  func.func @transform_7(%arg0: i32) -> (i32, i32) {
    %c0_i32 = arith.constant 0 : i32
    %c0_i32_0 = arith.constant 0 : i32
    %c0_i32_1 = arith.constant 0 : i32
    return %c0_i32, %c0_i32_0 : i32, i32
  }
  func.func @transform_8(%arg0: i32) -> (i32, i32) {
    %c0_i32 = arith.constant 0 : i32
    %c0_i32_0 = arith.constant 0 : i32
    %c0_i32_1 = arith.constant 0 : i32
    return %c0_i32, %c0_i32_0 : i32, i32
  }
  func.func @transform_9(%arg0: i32) -> (i32, i32) {
    %c0_i32 = arith.constant 0 : i32
    %c0_i32_0 = arith.constant 0 : i32
    %c0_i32_1 = arith.constant 0 : i32
    return %c0_i32, %c0_i32_0 : i32, i32
  }
  func.func @transform_10(%arg0: i32) -> (i32, i32) {
    %c0_i32 = arith.constant 0 : i32
    %c0_i32_0 = arith.constant 0 : i32
    %c0_i32_1 = arith.constant 0 : i32
    return %c0_i32, %c0_i32_0 : i32, i32
  }
  func.func @transform_11(%arg0: i32) -> (i32, i32) {
    %c0_i32 = arith.constant 0 : i32
    %c0_i32_0 = arith.constant 0 : i32
    %c0_i32_1 = arith.constant 0 : i32
    return %c0_i32, %c0_i32_0 : i32, i32
  }
  func.func @transform_12(%arg0: i32) -> (i32, i32) {
    %c0_i32 = arith.constant 0 : i32
    %c0_i32_0 = arith.constant 0 : i32
    %c0_i32_1 = arith.constant 0 : i32
    return %c0_i32, %c0_i32_0 : i32, i32
  }
  func.func @transform_13(%arg0: i32) -> (i32, i32) {
    %c0_i32 = arith.constant 0 : i32
    %c0_i32_0 = arith.constant 0 : i32
    %c0_i32_1 = arith.constant 0 : i32
    return %c0_i32, %c0_i32_0 : i32, i32
  }
  func.func @transform_14(%arg0: i32) -> (i32, i32) {
    %c0_i32 = arith.constant 0 : i32
    %c0_i32_0 = arith.constant 0 : i32
    %c0_i32_1 = arith.constant 0 : i32
    return %c0_i32, %c0_i32_0 : i32, i32
  }
  func.func @transform_15(%arg0: i32) -> (i32, i32) {
    %c0_i32 = arith.constant 0 : i32
    %c0_i32_0 = arith.constant 0 : i32
    %c0_i32_1 = arith.constant 0 : i32
    return %c0_i32, %c0_i32_0 : i32, i32
  }
  func.func @transform_16(%arg0: i32) -> (i32, i32) {
    %c0_i32 = arith.constant 0 : i32
    %c0_i32_0 = arith.constant 0 : i32
    %c0_i32_1 = arith.constant 0 : i32
    return %c0_i32, %c0_i32_0 : i32, i32
  }
  func.func @transform_17(%arg0: i32) -> (i32, i32) {
    %c0_i32 = arith.constant 0 : i32
    %c0_i32_0 = arith.constant 0 : i32
    return %arg0, %c0_i32 : i32, i32
  }
  func.func @transform_18(%arg0: i32) -> (i32, i32) {
    %c0_i32 = arith.constant 0 : i32
    %c0_i32_0 = arith.constant 0 : i32
    return %arg0, %c0_i32 : i32, i32
  }
}

</mosaic_0001>

<bundles_post_ra>
// kernel: cvae_forward.1
= control target key start
LH: loop header
LB: loop body
LE: loop exit
PB: predicated region body
PF: predicated region fallthrough
CT: control target
= control target key end

     0   :  { %s6374_s0 = inlined_call_operand.vmem [shape: f32[32,128], index: 0, kind: input, shape index: {}]   ;;  %s6375_s1 = inlined_call_operand.vmem [shape: f32[32,656], index: 1, kind: input, shape index: {}]   ;;  %s6376_s2 = inlined_call_operand.vmem [shape: f32[32,64], index: 2, kind: input, shape index: {}]   ;;  %s6377_s3 = inlined_call_operand.vmem [shape: bf16[128,256], index: 3, kind: input, shape index: {}]   ;;  %s6378_s4 = inlined_call_operand.vmem [shape: bf16[656,256], index: 4, kind: input, shape index: {}]   ;;  %s6379_s5 = inlined_call_operand.hbm [shape: f32[1,256], index: 5, kind: input, shape index: {}]   ;;  %s6380_s6 = inlined_call_operand.vmem [shape: bf16[256,128], index: 6, kind: input, shape index: {}]   ;;  %s6381_s7 = inlined_call_operand.hbm [shape: f32[1,128], index: 7, kind: input, shape index: {}]   ;;  %s6382_s8 = inlined_call_operand.vmem [shape: bf16[128,128], index: 8, kind: input, shape index: {}]   ;;  %s6383_s9 = inlined_call_operand.hbm [shape: f32[1,128], index: 9, kind: input, shape index: {}]   ;;  %s6384_s10 = inlined_call_operand.hbm [shape: bf16[64,128], index: 10, kind: input, shape index: {}]   ;;  %s6385_s11 = inlined_call_operand.vmem [shape: bf16[128,128], index: 11, kind: input, shape index: {}]   ;;  %s6386_s12 = inlined_call_operand.hbm [shape: f32[1,128], index: 12, kind: input, shape index: {}]   ;;  %s6387_s13 = inlined_call_operand.vmem [shape: bf16[128,256], index: 13, kind: input, shape index: {}]   ;;  %s6388_s14 = inlined_call_operand.hbm [shape: f32[1,256], index: 14, kind: input, shape index: {}]   ;;  %s6389_s15 = inlined_call_operand.vmem [shape: bf16[256,656], index: 15, kind: input, shape index: {}]   ;;  %s6390_s16 = inlined_call_operand.hbm [shape: f32[1,656], index: 16, kind: input, shape index: {}]   ;;  %s6391_s17 = inlined_call_operand.hbm [shape: f32[32,656], index: 17, kind: output, shape index: {0}]   ;;  %s6392_s18 = inlined_call_operand.vmem [shape: f32[32,128], index: 18, kind: output, shape index: {1}]  }
   0x1   :  { %6402 = sst [smem:[#allocation27_spill]] %s6374_s0 }
   0x2   :  { %6403 = sst [smem:[#allocation28_spill]] %s6375_s1 }
   0x3   :  { %6404 = sst [smem:[#allocation29_spill]] %s6376_s2 }
   0x4   :  { %6405 = sst [smem:[#allocation30_spill]] %s6381_s7 }
   0x5   :  { %6406 = sst [smem:[#allocation31_spill]] %s6384_s10 }
   0x6   :  { %6407 = sst [smem:[#allocation32_spill]] %s6391_s17 }
   0x7   :  { %24 = vsyncpa [#allocation3], 0 }
   0x8   :  { %25 = vsyncpa [#allocation6], 0 }
   0x9   :  { %26 = vsyncpa [#allocation9], 0 }
   0xa   :  { %27 = vsyncpa [#allocation12], 0 }
   0xb   :  { %28 = vsyncpa [#allocation4], 0 }
   0xc   :  { %30 = vsyncpa [#allocation4 + $0x1], 0  ;;  %s4768_s27 = smov 0   ;;  %s4770_s28 = smov 0  }
   0xd   :  { %s4772_s29 = smov 0   ;;  %s4774_s30 = smov 0  }
   0xe LB: > { %6408 = sst [smem:[#allocation20_spill]] %s4649_s27  ;;  %s4789_s0 = sadd.s32 4294967295, %s4661_s30   ;;  %s4661_s30 = sphi %s4774_s30, %s6429_s30   ;;  %s4657_s29 = sphi %s4772_s29, %s6431_s29   ;;  %s4653_s28 = sphi %s4770_s28, %s6433_s28   ;;  %s4649_s27 = sphi %s4768_s27, %s6432_s27  }
   0xf   : > { %6409 = sst [smem:[#allocation21_spill]] %s4657_s29  ;;  %s2994_s19 = sadd.s32 4294967294, %s4661_s30  }
  0x10   : > { %6410 = sst [smem:[#allocation22_spill]] %s4661_s30  ;;  %s4793_s1 = sadd.s32 1, %s4661_s30  }
  0x11   : > { %6411 = sst [smem:[#allocation23_spill]] %s4793_s1  ;;  %s415_s20 = sadd.s32 1, %s4657_s29 }
  0x12   : > { %s412_s21 = ssub.s32 %s4661_s30, %s4793_s1  ;;  %p425_p0 = scmp.ne.s32.totalorder %s4657_s29, %s4653_s28 }
  0x13   : > { %p413_p1 = scmp.eq.s32.totalorder %s412_s21, 0  ;;  %p426_p2 = scmp.eq.s32.totalorder %s4789_s0, 3 }
  0x14   : > { %p431_p3 = scmp.ne.s32.totalorder %s4653_s28, %s4649_s27  ;;  %p432_p4 = scmp.eq.s32.totalorder %s2994_s19, 3 }
  0x15   : > { %s4804_s22 = scalar_select %p413_p1, %s4657_s29, %s415_s20  }
  0x16   : > { %p4806_p5 = por %p426_p2, %p425_p0  ;;  %p4810_p6 = por %p432_p4, %p431_p3 }
  0x17   : > { %6412 = sst [smem:[#allocation24_spill]] %s4804_s22  ;;  %p2995_p7 = scmp.ge.s32.totalorder %s4661_s30, 1 }
  0x18   : > { %s6413_s2 = scalar_select %p4806_p5, 1, 0 }
  0x19   : > { %s6415_s23 = scalar_select %p4810_p6, 1, 0 }
  0x1a   : > { %6414 = sst [smem:[#allocation25_spill]] %s6413_s2  ;;  %p465_p8 = scmp.lt.s32.totalorder %s4661_s30, 5 }
  0x1b   : > { %6416 = sst [smem:[#allocation26_spill]] %s6415_s23  ;;  %p4311_p9 = scmp.eq.s32.totalorder %s4789_s0, 0 }
  0x1c   : > { %p4817_p10 = pnand %p2995_p7, %p465_p8  ;;  %s6418_s7 = sld [smem:[#allocation30_spill]] }
  0x1d   : > { %s4663_s20 = smov [#allocation5]   ;;  %s6419_s10 = sld [smem:[#allocation31_spill]] }
  0x1e   : > { %p4285_p11 = pneg %p4817_p10  ;;  %s500_s21 = sshll.u32 %s4663_s20, 4  ;;  %s501_s21 = int_to_ptr.vmem [resolvable:$true] %s500_s21 }
  0x1f   : > { %s4664_s25 = smov [#allocation8]   ;;  %s4665_s20 = smov 64  }
  0x20   : > { %p4831_p12 = pnand %p4311_p9, %p4285_p11  ;;  %s526_s26 = sshll.u32 %s4664_s25, 4  ;;  %s527_s26 = int_to_ptr.vmem [resolvable:$true] %s526_s26 }
  0x21   : > { %s4667_s27 = smov [#allocation11]   ;;  %s483_s25 = sshll.u32 %s6379_s5, 4  ;;  %s484_s25 = int_to_ptr.hbm [resolvable:$true] %s483_s25 }
  0x22   : > { %s498_s19 = sshll.u32 %s6418_s7, 4  ;;  %s4666_s7 = smov 4   ;;  %s499_s19 = int_to_ptr.hbm [resolvable:$true] %s498_s19 }
  0x23   : > { %s524_s1 = sshll.u32 %s6419_s10, 4  ;;  %s557_s10 = sshll.u32 %s6388_s14, 4  ;;  %s525_s1 = int_to_ptr.hbm [resolvable:$true] %s524_s1  ;;  %s558_s10 = int_to_ptr.hbm [resolvable:$true] %s557_s10 }
  0x24   : > { %4291 = dma.hbm_to_vmem [thread:$0]  (!%p4831_p12), %s499_s19, 16, %s501_s21, [#allocation6]  }
  0x25   : > { %4297 = dma.hbm_to_vmem [thread:$0]  (!%p4831_p12), %s525_s1, 512, %s527_s26, [#allocation9], %s4665_s20, %s4665_s20, %s4666_s7  }
  0x26   : > { %s559_s30 = sshll.u32 %s4667_s27, 4  ;;  %s4668_s19 = smov [#allocation2]   ;;  %s560_s30 = int_to_ptr.vmem [resolvable:$true] %s559_s30 }
  0x27   : > { %4303 = dma.hbm_to_vmem [thread:$0]  (!%p4831_p12), %s558_s10, 32, %s560_s30, [#allocation12]  }
  0x28   : > { %s485_s21 = sshll.u32 %s4668_s19, 4  ;;  %s513_s26 = sshll.u32 %s6383_s9, 4  ;;  %s486_s21 = int_to_ptr.vmem [resolvable:$true] %s485_s21  ;;  %s514_s26 = int_to_ptr.hbm [resolvable:$true] %s513_s26 }
  0x29   : > { %4288 = dma.hbm_to_vmem [thread:$0]  (!%p4831_p12), %s484_s25, 32, %s486_s21, [#allocation3]  }
  0x2a   : > { %s542_s17 = sshll.u32 %s6386_s12, 4  ;;  %s4669_s2 = smov [#allocation7]   ;;  %s543_s17 = int_to_ptr.hbm [resolvable:$true] %s542_s17 }
  0x2b   : > { %s515_s29 = sshll.u32 %s4669_s2, 4  ;;  %s4670_s10 = smov [#allocation10]   ;;  %s516_s29 = int_to_ptr.vmem [resolvable:$true] %s515_s29 }
  0x2c   : > { %4294 = dma.hbm_to_vmem [thread:$0]  (!%p4831_p12), %s514_s26, 16, %s516_s29, [#allocation6]  }
  0x2d   : > { %s544_s30 = sshll.u32 %s4670_s10, 4  ;;  %s572_s7 = sshll.u32 %s6390_s16, 4  ;;  %s545_s30 = int_to_ptr.vmem [resolvable:$true] %s544_s30  ;;  %s573_s7 = int_to_ptr.hbm [resolvable:$true] %s572_s7 }
  0x2e   : > { %4300 = dma.hbm_to_vmem [thread:$0]  (!%p4831_p12), %s543_s17, 16, %s545_s30, [#allocation9]  }
  0x2f   : > { %s4671_s25 = smov [#allocation13]   ;;  %609 = sbr.rel (%p4817_p10) target bundleno = 1146 (0x47a), region = 88 }
  0x30   : > { %s574_s21 = sshll.u32 %s4671_s25, 4  ;;  %s575_s21 = int_to_ptr.vmem [resolvable:$true] %s574_s21 }
  0x31   : > { %4306 = dma.hbm_to_vmem [thread:$0]  (!%p4831_p12), %s573_s7, 96, %s575_s21, [#allocation12]  }
  0x34   : > { %4628 = dma.done.wait (%p4311_p9), [#allocation3], 32  }
  0x35   : > { %4630 = vsyncadd (%p4311_p9), [#allocation3], 4294967264 }
  0x36   : > { %4632 = dma.done.wait (%p4311_p9), [#allocation6], 32  }
  0x37   : > { %4634 = vsyncadd (%p4311_p9), [#allocation6], 4294967264 }
  0x38   : > { %4636 = dma.done.wait (%p4311_p9), [#allocation9], 528  }
  0x39   : > { %4638 = vsyncadd (%p4311_p9), [#allocation9], 4294966768 }
  0x3a   : > { %4640 = dma.done.wait (%p4311_p9), [#allocation12], 128  }
  0x3b   : > { %4642 = vsyncadd (%p4311_p9), [#allocation12], 4294967168  ;;  %v3074_v0 = vld [vmem:[%s6378_s4 + $0x70] sm:$0xf]  ;;  %v4037_v1 = vld [vmem:[%s6378_s4 + $0x74] sm:$0xf0] }
  0x3c   : > { %v3138_v2 = vld [vmem:[%s6378_s4 + $0xf0] sm:$0xf]  ;;  %v3075_v3 = vor.u32 %v4037_v1, %v3074_v0  ;;  %v4053_v4 = vld [vmem:[%s6378_s4 + $0xf4] sm:$0xf0]  ;;  %v3066_v11 = vld [vmem:[%s6378_s4 + $0x60] sm:$0xf] }
  0x3d   : > { %v3202_v5 = vld [vmem:[%s6378_s4 + $0x170] sm:$0xf]  ;;  %v4069_v6 = vld [vmem:[%s6378_s4 + $0x174] sm:$0xf0]  ;;  %v3139_v7 = vor.u32 %v4053_v4, %v3138_v2  ;;  %v4035_v13 = vld [vmem:[%s6378_s4 + $0x64] sm:$0xf0] }
  0x3e   : > { %v3203_v8 = vor.u32 %v4069_v6, %v3202_v5  ;;  %v3266_v9 = vld [vmem:[%s6378_s4 + $0x1f0] sm:$0xf]  ;;  %v4085_v10 = vld [vmem:[%s6378_s4 + $0x1f4] sm:$0xf0]  ;;  %1250 = vmatpush.bf16.msra.mxu0 %v3075_v3  ;;  %v3130_v14 = vld [vmem:[%s6378_s4 + $0xe0] sm:$0xf]  ;;  %v3067_v16 = vor.u32 %v4035_v13, %v3066_v11 }
  0x3f   : > { %v3267_v12 = vor.u32 %v4085_v10, %v3266_v9  ;;  %v4051_v15 = vld [vmem:[%s6378_s4 + $0xe4] sm:$0xf0]  ;;  %1263 = vmatpush.bf16.msra.mxu1 %v3139_v7  ;;  %v3194_v18 = vld [vmem:[%s6378_s4 + $0x160] sm:$0xf]  ;;  %v3058_v23 = vld [vmem:[%s6378_s4 + $0x50] sm:$0xf] }
  0x40   : > { %1276 = vmatpush.bf16.msra.mxu2 %v3203_v8  ;;  %v3131_v17 = vor.u32 %v4051_v15, %v3130_v14  ;;  %v4067_v19 = vld [vmem:[%s6378_s4 + $0x164] sm:$0xf0]  ;;  %v3258_v20 = vld [vmem:[%s6378_s4 + $0x1e0] sm:$0xf]  ;;  %v4033_v24 = vld [vmem:[%s6378_s4 + $0x54] sm:$0xf0] }
  0x41   : > { %1289 = vmatpush.bf16.msra.mxu3 %v3267_v12  ;;  %v3195_v21 = vor.u32 %v4067_v19, %v3194_v18  ;;  %v4083_v22 = vld [vmem:[%s6378_s4 + $0x1e4] sm:$0xf0]  ;;  %v3122_v26 = vld [vmem:[%s6378_s4 + $0xd0] sm:$0xf]  ;;  %v4049_v27 = vld [vmem:[%s6378_s4 + $0xd4] sm:$0xf0]  ;;  %v3059_v29 = vor.u32 %v4033_v24, %v3058_v23 }
  0x42   : > { %v3259_v25 = vor.u32 %v4083_v22, %v3258_v20  ;;  %v3186_v28 = vld [vmem:[%s6378_s4 + $0x150] sm:$0xf]  ;;  %1251 = vmatpush.bf16.msra.mxu0 %v3067_v16  ;;  %v4065_v30 = vld [vmem:[%s6378_s4 + $0x154] sm:$0xf0]  ;;  %v3123_v33 = vor.u32 %v4049_v27, %v3122_v26  ;;  %v3050_v35 = vld [vmem:[%s6378_s4 + $0x40] sm:$0xf] }
  0x43   : > { %v3250_v31 = vld [vmem:[%s6378_s4 + $0x1d0] sm:$0xf]  ;;  %v4081_v32 = vld [vmem:[%s6378_s4 + $0x1d4] sm:$0xf0]  ;;  %1264 = vmatpush.bf16.msra.mxu1 %v3131_v17  ;;  %v3187_v34 = vor.u32 %v4065_v30, %v3186_v28  ;;  %v4031_v36 = vld [vmem:[%s6378_s4 + $0x44] sm:$0xf0] }
  0x44   : > { %1277 = vmatpush.bf16.msra.mxu2 %v3195_v21  ;;  %v3114_v37 = vld [vmem:[%s6378_s4 + $0xc0] sm:$0xf]  ;;  %v3251_v38 = vor.u32 %v4081_v32, %v3250_v31  ;;  %v4047_v39 = vld [vmem:[%s6378_s4 + $0xc4] sm:$0xf0]  ;;  %v3051_v44 = vor.u32 %v4031_v36, %v3050_v35  ;;  %p706_p13 = scmp.lt.s32.totalorder %s4789_s0, 3  ;;  %s6421_s22 = sld [smem:[#allocation28_spill]] }
  0x45   : > { %1290 = vmatpush.bf16.msra.mxu3 %v3259_v25  ;;  %v3178_v40 = vld [vmem:[%s6378_s4 + $0x140] sm:$0xf]  ;;  %v4063_v41 = vld [vmem:[%s6378_s4 + $0x144] sm:$0xf0]  ;;  %v3115_v45 = vor.u32 %v4047_v39, %v3114_v37  ;;  %v3042_v47 = vld [vmem:[%s6378_s4 + $0x30] sm:$0xf] }
  0x46   : > { %v3242_v42 = vld [vmem:[%s6378_s4 + $0x1c0] sm:$0xf]  ;;  %v4079_v43 = vld [vmem:[%s6378_s4 + $0x1c4] sm:$0xf0]  ;;  %1252 = vmatpush.bf16.msra.mxu0 %v3059_v29  ;;  %v3179_v46 = vor.u32 %v4063_v41, %v3178_v40  ;;  %v4029_v48 = vld [vmem:[%s6378_s4 + $0x34] sm:$0xf0] }
  0x47   : > { %1265 = vmatpush.bf16.msra.mxu1 %v3123_v33  ;;  %v3106_v49 = vld [vmem:[%s6378_s4 + $0xb0] sm:$0xf]  ;;  %v3243_v50 = vor.u32 %v4079_v43, %v3242_v42  ;;  %v4045_v51 = vld [vmem:[%s6378_s4 + $0xb4] sm:$0xf0]  ;;  %v3043_v56 = vor.u32 %v4029_v48, %v3042_v47  ;;  %s5006_s23 = scalar_select %p706_p13, %s4789_s0, 3  ;;  %vm1246_vm0 = vcmask 130048  }
  0x48   : > { %1278 = vmatpush.bf16.msra.mxu2 %v3187_v34  ;;  %v3170_v52 = vld [vmem:[%s6378_s4 + $0x130] sm:$0xf]  ;;  %v4061_v53 = vld [vmem:[%s6378_s4 + $0x134] sm:$0xf0]  ;;  %v3107_v57 = vor.u32 %v4045_v51, %v3106_v49  ;;  %v3034_v59 = vld [vmem:[%s6378_s4 + $0x20] sm:$0xf] }
  0x49   : > { %1291 = vmatpush.bf16.msra.mxu3 %v3251_v38  ;;  %v3234_v54 = vld [vmem:[%s6378_s4 + $0x1b0] sm:$0xf]  ;;  %v4077_v55 = vld [vmem:[%s6378_s4 + $0x1b4] sm:$0xf0]  ;;  %v3171_v58 = vor.u32 %v4061_v53, %v3170_v52  ;;  %v4027_v60 = vld [vmem:[%s6378_s4 + $0x24] sm:$0xf0] }
  0x4a   : > { %1253 = vmatpush.bf16.msra.mxu0 %v3051_v44  ;;  %v3098_v61 = vld [vmem:[%s6378_s4 + $0xa0] sm:$0xf]  ;;  %v3235_v62 = vor.u32 %v4077_v55, %v3234_v54  ;;  %v4043_v63 = vld [vmem:[%s6378_s4 + $0xa4] sm:$0xf0]  ;;  %v3035_v4 = vor.u32 %v4027_v60, %v3034_v59  ;;  %s4253_s1 = smul.u32 48, %s5006_s23  ;;  %s5479_s17 = sshll.u32 %s5006_s23, 3 }
  0x4b   : > { %1266 = vmatpush.bf16.msra.mxu1 %v3115_v45  ;;  %v3162_v0 = vld [vmem:[%s6378_s4 + $0x120] sm:$0xf]  ;;  %v4059_v1 = vld [vmem:[%s6378_s4 + $0x124] sm:$0xf0]  ;;  %v3099_v5 = vor.u32 %v4043_v63, %v3098_v61  ;;  %v3026_v7 = vld [vmem:[%s6378_s4 + $0x10] sm:$0xf]  ;;  %s722_s27 = scalar_lea.vmem %s6392_s18, %s5479_s17 }
  0x4c   : > { %1279 = vmatpush.bf16.msra.mxu2 %v3179_v46  ;;  %v3226_v2 = vld [vmem:[%s6378_s4 + $0x1a0] sm:$0xf]  ;;  %v4075_v3 = vld [vmem:[%s6378_s4 + $0x1a4] sm:$0xf0]  ;;  %v3163_v6 = vor.u32 %v4059_v1, %v3162_v0  ;;  %v4025_v8 = vld [vmem:[%s6378_s4 + $0x14] sm:$0xf0]  ;;  %s5089_s19 = scalar_lea.vmem %s6421_s22, %s4253_s1 }
  0x4d   : > { %1292 = vmatpush.bf16.msra.mxu3 %v3243_v50  ;;  %v3090_v9 = vld [vmem:[%s6378_s4 + $0x90] sm:$0xf]  ;;  %v3227_v10 = vor.u32 %v4075_v3, %v3226_v2  ;;  %v4041_v11 = vld [vmem:[%s6378_s4 + $0x94] sm:$0xf0]  ;;  %v3027_v16 = vor.u32 %v4025_v8, %v3026_v7  ;;  %v3018_v17 = vld [vmem:[%s6378_s4] sm:$0xf] }
  0x4e   : > { %1254 = vmatpush.bf16.msra.mxu0 %v3043_v56  ;;  %v3154_v12 = vld [vmem:[%s6378_s4 + $0x110] sm:$0xf]  ;;  %v4057_v13 = vld [vmem:[%s6378_s4 + $0x114] sm:$0xf0]  ;;  %v4023_v18 = vld [vmem:[%s6378_s4 + $0x4] sm:$0xf0]  ;;  %v3091_v20 = vor.u32 %v4041_v11, %v3090_v9 }
  0x4f   : > { %1267 = vmatpush.bf16.msra.mxu1 %v3107_v57  ;;  %v3218_v14 = vld [vmem:[%s6378_s4 + $0x190] sm:$0xf]  ;;  %v4073_v15 = vld [vmem:[%s6378_s4 + $0x194] sm:$0xf0]  ;;  %v3082_v19 = vld [vmem:[%s6378_s4 + $0x80] sm:$0xf]  ;;  %v3155_v21 = vor.u32 %v4057_v13, %v3154_v12  ;;  %v3019_v32 = vor.u32 %v4023_v18, %v3018_v17 }
  0x50   : > { %1280 = vmatpush.bf16.msra.mxu2 %v3171_v58  ;;  %v4039_v22 = vld [vmem:[%s6378_s4 + $0x84] sm:$0xf0]  ;;  %v3146_v23 = vld [vmem:[%s6378_s4 + $0x100] sm:$0xf]  ;;  %v3219_v25 = vor.u32 %v4073_v15, %v3218_v14  ;;  %v3330_v28 = vld [vmem:[%s6378_s4 + $0x270] sm:$0xf] }
  0x51   : > { %1293 = vmatpush.bf16.msra.mxu3 %v3235_v62  ;;  %v4055_v24 = vld [vmem:[%s6378_s4 + $0x104] sm:$0xf0]  ;;  %v3210_v26 = vld [vmem:[%s6378_s4 + $0x180] sm:$0xf]  ;;  %v4101_v29 = vld [vmem:[%s6378_s4 + $0x274] sm:$0xf0]  ;;  %v3083_v36 = vor.u32 %v4039_v22, %v3082_v19 }
  0x52   : > { %1255 = vmatpush.bf16.msra.mxu0 %v3035_v4  ;;  %v4071_v27 = vld [vmem:[%s6378_s4 + $0x184] sm:$0xf0]  ;;  %v4036_v30 = vld [vmem:[%s6378_s4 + $0x74] sm:$0xf]  ;;  %v3076_v31 = vld [vmem:[%s6378_s4 + $0x78] sm:$0xf0]  ;;  %v3147_v37 = vor.u32 %v4055_v24, %v3146_v23  ;;  %v3331_v42 = vor.u32 %v4101_v29, %v3330_v28 }
  0x53   : > { %1268 = vmatpush.bf16.msra.mxu1 %v3099_v5  ;;  %v4052_v33 = vld [vmem:[%s6378_s4 + $0xf4] sm:$0xf]  ;;  %v3140_v34 = vld [vmem:[%s6378_s4 + $0xf8] sm:$0xf0]  ;;  %v3338_v35 = vld [vmem:[%s6378_s4 + $0x280] sm:$0xf]  ;;  %v3211_v41 = vor.u32 %v4071_v27, %v3210_v26  ;;  %v3079_v46 = vor.u32 %v4036_v30, %v3076_v31 }
  0x54   : > { %1281 = vmatpush.bf16.msra.mxu2 %v3163_v6  ;;  %v4103_v38 = vld [vmem:[%s6378_s4 + $0x284] sm:$0xf0]  ;;  %v4068_v40 = vld [vmem:[%s6378_s4 + $0x174] sm:$0xf]  ;;  %v3204_v43 = vld [vmem:[%s6378_s4 + $0x178] sm:$0xf0]  ;;  %v3143_v47 = vor.u32 %v4052_v33, %v3140_v34 }
  0x55   : > { %1294 = vmatpush.bf16.msra.mxu3 %v3227_v10  ;;  %v727_v39 = vld [vmem:[%s5089_s19 + $0x8] sm:$0xff]  ;;  %v3322_v44 = vld [vmem:[%s6378_s4 + $0x260] sm:$0xf]  ;;  %v729_v45 = vld [vmem:[%s5089_s19 + $0x18] sm:$0xff]  ;;  %v3339_v51 = vor.u32 %v4103_v38, %v3338_v35  ;;  %v3207_v58 = vor.u32 %v4068_v40, %v3204_v43  ;;  %s6422_s7 = sld [smem:[#allocation27_spill]]  ;;  %s4672_s22 = smov 64  }
  0x56   : > { %1256 = vmatpush.bf16.msra.mxu0 %v3027_v16  ;;  %v4099_v48 = vld [vmem:[%s6378_s4 + $0x264] sm:$0xf0]  ;;  %v4034_v49 = vld [vmem:[%s6378_s4 + $0x64] sm:$0xf]  ;;  %v728_v50 = vld [vmem:[%s5089_s19 + $0x10] sm:$0xff]  ;;  %v5141_v56 = vpack.c.bf16 %v727_v39, %v727_v39  ;;  %v5143_v57 = vpack.c.bf16 %v729_v45, %v729_v45  ;;  %s6423_s24 = sld [smem:[#allocation29_spill]] }
  0x57   : > { %1269 = vmatpush.bf16.msra.mxu1 %v3091_v20  ;;  %v3068_v52 = vld [vmem:[%s6378_s4 + $0x68] sm:$0xf0]  ;;  %v4050_v53 = vld [vmem:[%s6378_s4 + $0xe4] sm:$0xf]  ;;  %v5139_v55 = vpack.c.bf16 %v728_v50, %v728_v50  ;;  %v3323_v59 = vor.u32 %v4099_v48, %v3322_v44  ;;  %v3314_v1 = vld [vmem:[%s6378_s4 + $0x250] sm:$0xf] }
  0x58   : > { %1282 = vmatpush.bf16.msra.mxu2 %v3155_v21  ;;  %v3132_v54 = vld [vmem:[%s6378_s4 + $0xe8] sm:$0xf0]  ;;  %v4066_v60 = vld [vmem:[%s6378_s4 + $0x164] sm:$0xf]  ;;  %v3071_v63 = vor.u32 %v4034_v49, %v3068_v52  ;;  %v4097_v2 = vld [vmem:[%s6378_s4 + $0x254] sm:$0xf0] }
  0x59   : > { %1295 = vmatpush.bf16.msra.mxu3 %v3219_v25  ;;  %v3196_v61 = vld [vmem:[%s6378_s4 + $0x168] sm:$0xf0]  ;;  %v726_v62 = vld [vmem:[%s5089_s19] sm:$0xff]  ;;  %v3135_v0 = vor.u32 %v4050_v53, %v3132_v54  ;;  %v4032_v3 = vld [vmem:[%s6378_s4 + $0x54] sm:$0xf]  ;;  %v3315_v9 = vor.u32 %v4097_v2, %v3314_v1  ;;  %vm1886_vm1 = vcmask 523264  }
  0x5a   : > { %1257 = vmatpush.bf16.msra.mxu0 %v3019_v32  ;;  %v3060_v4 = vld [vmem:[%s6378_s4 + $0x58] sm:$0xf0]  ;;  %v4048_v5 = vld [vmem:[%s6378_s4 + $0xd4] sm:$0xf]  ;;  %v5171_v7 = vpack.c.bf16 %v726_v62, %v726_v62  ;;  %v3199_v8 = vor.u32 %v4066_v60, %v3196_v61  ;;  %v3306_v14 = vld [vmem:[%s6378_s4 + $0x240] sm:$0xf] }
  0x5b   : > { %1270 = vmatpush.bf16.msra.mxu1 %v3083_v36  ;;  %v3124_v6 = vld [vmem:[%s6378_s4 + $0xd8] sm:$0xf0]  ;;  %v4064_v10 = vld [vmem:[%s6378_s4 + $0x154] sm:$0xf]  ;;  %v3063_v12 = vor.u32 %v4032_v3, %v3060_v4  ;;  %v4095_v15 = vld [vmem:[%s6378_s4 + $0x244] sm:$0xf0]  ;;  %s709_s25 = scalar_lea.vmem %s6422_s7, %s5479_s17 }
  0x5c   : > { %1283 = vmatpush.bf16.msra.mxu2 %v3147_v37  ;;  %v3188_v11 = vld [vmem:[%s6378_s4 + $0x158] sm:$0xf0]  ;;  %v3127_v13 = vor.u32 %v4048_v5, %v3124_v6  ;;  %v4030_v16 = vld [vmem:[%s6378_s4 + $0x44] sm:$0xf]  ;;  %v3052_v17 = vld [vmem:[%s6378_s4 + $0x48] sm:$0xf0]  ;;  %v3307_v21 = vor.u32 %v4095_v15, %v3306_v14  ;;  %s718_s26 = scalar_lea.vmem %s6423_s24, %s5479_s17 }
  0x5d   : > { %1296 = vmatpush.bf16.msra.mxu3 %v3211_v41  ;;  %v4046_v18 = vld [vmem:[%s6378_s4 + $0xc4] sm:$0xf]  ;;  %v3116_v19 = vld [vmem:[%s6378_s4 + $0xc8] sm:$0xf0]  ;;  %1258 = vmatmul.bf16.vlgmr.msra.gmra.mxu0 %v5171_v7  ;;  %v3191_v20 = vor.u32 %v4064_v10, %v3188_v11  ;;  %v3055_v24 = vor.u32 %v4030_v16, %v3052_v17  ;;  %v3298_v26 = vld [vmem:[%s6378_s4 + $0x230] sm:$0xf] }
  0x5e   : > { %1302 = vmatpush.bf16.msrb.mxu0 %v3331_v42  ;;  %1271 = vmatmul.bf16.vlgmr.msra.gmra.mxu1 %v5141_v56  ;;  %v4062_v22 = vld [vmem:[%s6378_s4 + $0x144] sm:$0xf]  ;;  %v3180_v23 = vld [vmem:[%s6378_s4 + $0x148] sm:$0xf0]  ;;  %v3119_v25 = vor.u32 %v4046_v18, %v3116_v19  ;;  %v4093_v27 = vld [vmem:[%s6378_s4 + $0x234] sm:$0xf0] }
  0x5f   : > { %1322 = vmatpush.bf16.msrb.mxu1 %v3339_v51  ;;  %1284 = vmatmul.bf16.vlgmr.msra.gmra.mxu2 %v5139_v55  ;;  %v4028_v28 = vld [vmem:[%s6378_s4 + $0x34] sm:$0xf]  ;;  %v3044_v29 = vld [vmem:[%s6378_s4 + $0x38] sm:$0xf0]  ;;  %v3183_v32 = vor.u32 %v4062_v22, %v3180_v23  ;;  %v3299_v33 = vor.u32 %v4093_v27, %v3298_v26  ;;  %v731_v36 = vld [vmem:[%s5089_s19 + $0x28] sm:$0xff]  ;;  %s4254_s1 = smul.u32 48, %s4789_s0 }
  0x60   : > { %1328 = vmatpush.bf16.msrb.mxu2 %v3079_v46  ;;  %1297 = vmatmul.bf16.vlgmr.msra.gmra.mxu3 %v5143_v57  ;;  %v4044_v30 = vld [vmem:[%s6378_s4 + $0xb4] sm:$0xf]  ;;  %v3108_v31 = vld [vmem:[%s6378_s4 + $0xb8] sm:$0xf0]  ;;  %v3047_v37 = vor.u32 %v4028_v28, %v3044_v29  ;;  %v3290_v39 = vld [vmem:[%s6378_s4 + $0x220] sm:$0xf]  ;;  %v5249_v45 = vpack.c.bf16 %v731_v36, %v731_v36 }
  0x61   : > { %1341 = vmatpush.bf16.msrb.mxu3 %v3143_v47  ;;  %v4060_v34 = vld [vmem:[%s6378_s4 + $0x134] sm:$0xf]  ;;  %v3172_v35 = vld [vmem:[%s6378_s4 + $0x138] sm:$0xf0]  ;;  %v3111_v38 = vor.u32 %v4044_v30, %v3108_v31  ;;  %v4091_v40 = vld [vmem:[%s6378_s4 + $0x224] sm:$0xf0] }
  0x62   : > { %1303 = vmatpush.bf16.msrb.mxu0 %v3323_v59  ;;  %v4026_v41 = vld [vmem:[%s6378_s4 + $0x24] sm:$0xf]  ;;  %v3036_v42 = vld [vmem:[%s6378_s4 + $0x28] sm:$0xf0]  ;;  %v3175_v46 = vor.u32 %v4060_v34, %v3172_v35  ;;  %v3291_v47 = vor.u32 %v4091_v40, %v3290_v39  ;;  %v3282_v52 = vld [vmem:[%s6378_s4 + $0x210] sm:$0xf] }
  0x63   : > { %1354 = vmatpush.bf16.msra.mxu1 %v3207_v58  ;;  %v4042_v43 = vld [vmem:[%s6378_s4 + $0xa4] sm:$0xf]  ;;  %v3100_v44 = vld [vmem:[%s6378_s4 + $0xa8] sm:$0xf0]  ;;  %v3039_v50 = vor.u32 %v4026_v41, %v3036_v42  ;;  %v4089_v53 = vld [vmem:[%s6378_s4 + $0x214] sm:$0xf0] }
  0x64   : > { %1329 = vmatpush.bf16.msrb.mxu2 %v3071_v63  ;;  %v4058_v48 = vld [vmem:[%s6378_s4 + $0x124] sm:$0xf]  ;;  %v3164_v49 = vld [vmem:[%s6378_s4 + $0x128] sm:$0xf0]  ;;  %v3103_v51 = vor.u32 %v4042_v43, %v3100_v44  ;;  %v4024_v54 = vld [vmem:[%s6378_s4 + $0x14] sm:$0xf]  ;;  %v3283_v62 = vor.u32 %v4089_v53, %v3282_v52 }
  0x65   : > { %1342 = vmatpush.bf16.msrb.mxu3 %v3135_v0  ;;  %v3028_v58 = vld [vmem:[%s6378_s4 + $0x18] sm:$0xf0]  ;;  %v4040_v59 = vld [vmem:[%s6378_s4 + $0x94] sm:$0xf]  ;;  %v3167_v61 = vor.u32 %v4058_v48, %v3164_v49  ;;  %v3274_v1 = vld [vmem:[%s6378_s4 + $0x200] sm:$0xf] }
  0x66   : > { %1304 = vmatpush.bf16.msrb.mxu0 %v3315_v9  ;;  %v3092_v60 = vld [vmem:[%s6378_s4 + $0x98] sm:$0xf0]  ;;  %v4056_v63 = vld [vmem:[%s6378_s4 + $0x114] sm:$0xf]  ;;  %v3031_v2 = vor.u32 %v4024_v54, %v3028_v58  ;;  %v4087_v4 = vld [vmem:[%s6378_s4 + $0x204] sm:$0xf0] }
  0x67   : > { %1355 = vmatpush.bf16.msra.mxu1 %v3199_v8  ;;  %v3156_v0 = vld [vmem:[%s6378_s4 + $0x118] sm:$0xf0]  ;;  %v3095_v3 = vor.u32 %v4040_v59, %v3092_v60  ;;  %v4022_v5 = vld [vmem:[%s6378_s4 + $0x4] sm:$0xf]  ;;  %v3020_v6 = vld [vmem:[%s6378_s4 + $0x8] sm:$0xf0]  ;;  %v3275_v15 = vor.u32 %v4087_v4, %v3274_v1 }
  0x68   : > { %1330 = vmatpush.bf16.msrb.mxu2 %v3063_v12  ;;  %v4038_v8 = vld [vmem:[%s6378_s4 + $0x84] sm:$0xf]  ;;  %v3084_v9 = vld [vmem:[%s6378_s4 + $0x88] sm:$0xf0]  ;;  %v4084_v10 = vld [vmem:[%s6378_s4 + $0x1f4] sm:$0xf]  ;;  %v3159_v14 = vor.u32 %v4056_v63, %v3156_v0  ;;  %v3023_v19 = vor.u32 %v4022_v5, %v3020_v6 }
  0x69   : > { %1343 = vmatpush.bf16.msrb.mxu3 %v3127_v13  ;;  %v3268_v11 = vld [vmem:[%s6378_s4 + $0x1f8] sm:$0xf0]  ;;  %v4100_v12 = vld [vmem:[%s6378_s4 + $0x274] sm:$0xf]  ;;  %v730_v16 = vld [vmem:[%s5089_s19 + $0x20] sm:$0xff]  ;;  %s6424_s10 = sld [smem:[#allocation32_spill]] }
  0x6a   : > { %1305 = vmatpush.bf16.msrb.mxu0 %v3307_v21  ;;  %v3332_v13 = vld [vmem:[%s6378_s4 + $0x278] sm:$0xf0]  ;;  %v4102_v17 = vld [vmem:[%s6378_s4 + $0x284] sm:$0xf]  ;;  %v3340_v18 = vld [vmem:[%s6378_s4 + $0x288] sm:$0xf0]  ;;  %v3271_v23 = vor.u32 %v4084_v10, %v3268_v11  ;;  %v5335_v28 = vpack.c.bf16 %v730_v16, %v730_v16 }
  0x6b   : > { %1356 = vmatpush.bf16.msra.mxu1 %v3191_v20  ;;  %v3087_v20 = vor.u32 %v4038_v8, %v3084_v9  ;;  %v4054_v21 = vld [vmem:[%s6378_s4 + $0x104] sm:$0xf]  ;;  %v3148_v22 = vld [vmem:[%s6378_s4 + $0x108] sm:$0xf0]  ;;  %v4021_v26 = vld [vmem:[%s6377_s3 + $0x74] sm:$0xf0]  ;;  %v3343_v29 = vor.u32 %v4102_v17, %v3340_v18 }
  0x6c   : > { %1331 = vmatpush.bf16.msrb.mxu2 %v3055_v24  ;;  %v3335_v24 = vor.u32 %v4100_v12, %v3332_v13  ;;  %v4020_v27 = vld [vmem:[%s6377_s3 + $0x74] sm:$0xf]  ;;  %v3406_v30 = vld [vmem:[%s6377_s3 + $0x78] sm:$0xf0]  ;;  %v4082_v31 = vld [vmem:[%s6378_s4 + $0x1e4] sm:$0xf] }
  0x6d   : > { %1344 = vmatpush.bf16.msrb.mxu3 %v3119_v25  ;;  %v3404_v25 = vld [vmem:[%s6377_s3 + $0x70] sm:$0xf]  ;;  %v4098_v34 = vld [vmem:[%s6378_s4 + $0x264] sm:$0xf]  ;;  %v3324_v35 = vld [vmem:[%s6378_s4 + $0x268] sm:$0xf0] }
  0x6e   : > { %1306 = vmatpush.bf16.msrb.mxu0 %v3299_v33  ;;  %3344 = vmatmul.msk.bf16.vlgmr.msrb.gmra.mxu1 %vm1246_vm0, %v5249_v45  ;;  %v3151_v33 = vor.u32 %v4054_v21, %v3148_v22  ;;  %v3405_v36 = vor.u32 %v4021_v26, %v3404_v25  ;;  %v3396_v39 = vld [vmem:[%s6377_s3 + $0x60] sm:$0xf]  ;;  %v4019_v40 = vld [vmem:[%s6377_s3 + $0x64] sm:$0xf0]  ;;  %v4018_v41 = vld [vmem:[%s6377_s3 + $0x64] sm:$0xf]  ;;  %v3327_v42 = vor.u32 %v4098_v34, %v3324_v35 }
  0x6f   : > { %1357 = vmatpush.bf16.msra.mxu1 %v3183_v32  ;;  %v3260_v32 = vld [vmem:[%s6378_s4 + $0x1e8] sm:$0xf0]  ;;  %v4080_v44 = vld [vmem:[%s6378_s4 + $0x1d4] sm:$0xf]  ;;  %v3316_v48 = vld [vmem:[%s6378_s4 + $0x258] sm:$0xf0]  ;;  %v3397_v49 = vor.u32 %v4019_v40, %v3396_v39  ;;  %s2810_s30 = scalar_lea.hbm %s6424_s10, %s4254_s1 }
  0x70   : > { %1332 = vmatpush.bf16.msrb.mxu2 %v3047_v37  ;;  %v3409_v37 = vor.u32 %v4020_v27, %v3406_v30  ;;  %v3398_v43 = vld [vmem:[%s6377_s3 + $0x68] sm:$0xf0]  ;;  %v4078_v54 = vld [vmem:[%s6378_s4 + $0x1c4] sm:$0xf]  ;;  %v4015_v1 = vld [vmem:[%s6377_s3 + $0x44] sm:$0xf0] }
  0x71   : > { %1345 = vmatpush.bf16.msrb.mxu3 %v3111_v38  ;;  %v3263_v38 = vor.u32 %v4082_v31, %v3260_v32  ;;  %v3401_v52 = vor.u32 %v4018_v41, %v3398_v43  ;;  %v3244_v59 = vld [vmem:[%s6378_s4 + $0x1c8] sm:$0xf0]  ;;  %v4094_v60 = vld [vmem:[%s6378_s4 + $0x244] sm:$0xf]  ;;  %v4076_v5 = vld [vmem:[%s6378_s4 + $0x1b4] sm:$0xf] }
  0x72   : > { %1307 = vmatpush.bf16.msrb.mxu0 %v3291_v47  ;;  %v4096_v47 = vld [vmem:[%s6378_s4 + $0x254] sm:$0xf]  ;;  %v3247_v0 = vor.u32 %v4078_v54, %v3244_v59  ;;  %v3382_v4 = vld [vmem:[%s6377_s3 + $0x48] sm:$0xf0]  ;;  %v3236_v6 = vld [vmem:[%s6378_s4 + $0x1b8] sm:$0xf0] }
  0x73   : > { %1358 = vmatpush.bf16.msra.mxu1 %v3175_v46  ;;  %v3252_v46 = vld [vmem:[%s6378_s4 + $0x1d8] sm:$0xf0]  ;;  %v3319_v58 = vor.u32 %v4096_v47, %v3316_v48  ;;  %v4092_v8 = vld [vmem:[%s6378_s4 + $0x234] sm:$0xf]  ;;  %v3239_v12 = vor.u32 %v4076_v5, %v3236_v6  ;;  %v3372_v13 = vld [vmem:[%s6377_s3 + $0x30] sm:$0xf] }
  0x74   : > { %1333 = vmatpush.bf16.msrb.mxu2 %v3039_v50  ;;  %v3388_v50 = vld [vmem:[%s6377_s3 + $0x50] sm:$0xf]  ;;  %v3255_v53 = vor.u32 %v4080_v44, %v3252_v46  ;;  %v3300_v9 = vld [vmem:[%s6378_s4 + $0x238] sm:$0xf0]  ;;  %v4074_v18 = vld [vmem:[%s6378_s4 + $0x1a4] sm:$0xf] }
  0x75   : > { %1346 = vmatpush.bf16.msrb.mxu3 %v3103_v51  ;;  %v4016_v51 = vld [vmem:[%s6377_s3 + $0x54] sm:$0xf]  ;;  %v3303_v16 = vor.u32 %v4092_v8, %v3300_v9  ;;  %v3374_v17 = vld [vmem:[%s6377_s3 + $0x38] sm:$0xf0]  ;;  %v3292_v21 = vld [vmem:[%s6378_s4 + $0x228] sm:$0xf0] }
  0x76   : > { %1308 = vmatpush.bf16.msrb.mxu0 %v3283_v62  ;;  %v3364_v25 = vld [vmem:[%s6377_s3 + $0x20] sm:$0xf]  ;;  %v4011_v26 = vld [vmem:[%s6377_s3 + $0x24] sm:$0xf0]  ;;  %v4010_v27 = vld [vmem:[%s6377_s3 + $0x24] sm:$0xf] }
  0x77   : > { %1359 = vmatpush.bf16.msra.mxu1 %v3167_v61  ;;  %v3308_v61 = vld [vmem:[%s6378_s4 + $0x248] sm:$0xf0]  ;;  %v4072_v31 = vld [vmem:[%s6378_s4 + $0x194] sm:$0xf]  ;;  %v3220_v32 = vld [vmem:[%s6378_s4 + $0x198] sm:$0xf0]  ;;  %v3365_v35 = vor.u32 %v4011_v26, %v3364_v25 }
  0x78   : > { %1334 = vmatpush.bf16.msrb.mxu2 %v3031_v2  ;;  %v4014_v2 = vld [vmem:[%s6377_s3 + $0x44] sm:$0xf]  ;;  %v3366_v30 = vld [vmem:[%s6377_s3 + $0x28] sm:$0xf0]  ;;  %v3284_v34 = vld [vmem:[%s6378_s4 + $0x218] sm:$0xf0] }
  0x79   : > { %1347 = vmatpush.bf16.msrb.mxu3 %v3095_v3  ;;  %v3311_v3 = vor.u32 %v4094_v60, %v3308_v61  ;;  %v3385_v11 = vor.u32 %v4014_v2, %v3382_v4  ;;  %v4008_v39 = vld [vmem:[%s6377_s3 + $0x14] sm:$0xf]  ;;  %v3358_v41 = vld [vmem:[%s6377_s3 + $0x18] sm:$0xf0]  ;;  %v3212_v43 = vld [vmem:[%s6378_s4 + $0x188] sm:$0xf0] }
  0x7a   : > { %1309 = vmatpush.bf16.msrb.mxu0 %v3275_v15  ;;  %v4012_v15 = vld [vmem:[%s6377_s3 + $0x34] sm:$0xf]  ;;  %v4086_v44 = vld [vmem:[%s6378_s4 + $0x204] sm:$0xf]  ;;  %v3276_v46 = vld [vmem:[%s6378_s4 + $0x208] sm:$0xf0]  ;;  %v3361_v48 = vor.u32 %v4008_v39, %v3358_v41 }
  0x7b   : > { %1360 = vmatpush.bf16.msra.mxu1 %v3159_v14  ;;  %v4013_v14 = vld [vmem:[%s6377_s3 + $0x34] sm:$0xf0]  ;;  %v724_v54 = vld [vmem:[%s709_s25] sm:$0xff]  ;;  %v4109_v2 = vld [vmem:[%s6380_s6 + $0x28] sm:$0xff]  ;;  %s2814_s7 = sshll.u32 %s2810_s30, 4  ;;  %s2815_s7 = int_to_ptr.hbm [resolvable:$true] %s2814_s7 }
  0x7c   : > { %1335 = vmatpush.bf16.msrb.mxu2 %v3023_v19  ;;  %v3228_v19 = vld [vmem:[%s6378_s4 + $0x1a8] sm:$0xf0]  ;;  %v3373_v22 = vor.u32 %v4013_v14, %v3372_v13  ;;  %v5521_v59 = vpack.c.bf16 %v724_v54, %v724_v54  ;;  %v4118_v4 = vld [vmem:[%s6380_s6 + $0x70] sm:$0xff]  ;;  %v4108_v8 = vld [vmem:[%s6380_s6 + $0x20] sm:$0xff]  ;;  %s4597_s25 = sshra.s32 %s2815_s7, 4  ;;  %s4598_s25 = int_to_ptr.hbm [resolvable:$true] %s4597_s25 }
  0x7d   : > { %1348 = vmatpush.bf16.msrb.mxu3 %v3087_v20  ;;  %1310 = vmatmul.bf16.vlgmr.msrb.gmra.mxu0 %v5335_v28  ;;  %v4090_v20 = vld [vmem:[%s6378_s4 + $0x224] sm:$0xf]  ;;  %v4117_v9 = vld [vmem:[%s6380_s6 + $0x68] sm:$0xff]  ;;  %v4106_v13 = vld [vmem:[%s6380_s6 + $0x10] sm:$0xff]  ;;  %s4599_s19 = scalar_lea.hbm %s4598_s25, 48  ;;  %p4604_p3 = scmp.lt.s32.totalorder %s4598_s25, %s6424_s10 }
  0x7e   : > { %1367 = vmatpush.bf16.msra.mxu0 %v3271_v23  ;;  %v3377_v23 = vor.u32 %v4012_v15, %v3374_v17  ;;  %v4115_v15 = vld [vmem:[%s6380_s6 + $0x58] sm:$0xff]  ;;  %v4112_v25 = vld [vmem:[%s6380_s6 + $0x40] sm:$0xff]  ;;  %p4600_p0 = scmp.ne.s32.totalorder %s4598_s25, %s4599_s19 }
  0x7f   : > { %1361 = vmatpush.bf16.msra.mxu1 %v3151_v33  ;;  %1336 = vmatmul.bf16.vlgmr.msrb.gmra.mxu2 %v5171_v7  ;;  %v3390_v7 = vld [vmem:[%s6377_s3 + $0x58] sm:$0xf0]  ;;  %v4088_v33 = vld [vmem:[%s6378_s4 + $0x214] sm:$0xf] }
  0x80   : > { %1380 = vmatpush.bf16.msra.mxu2 %v3335_v24  ;;  %1349 = vmatmul.bf16.vlgmr.msrb.gmra.mxu3 %v5141_v56  ;;  %v4017_v56 = vld [vmem:[%s6377_s3 + $0x54] sm:$0xf0]  ;;  %v3393_v63 = vor.u32 %v4016_v51, %v3390_v7  ;;  %v3231_v24 = vor.u32 %v4074_v18, %v3228_v19  ;;  %v3287_v40 = vor.u32 %v4088_v33, %v3284_v34  ;;  %v4114_v18 = vld [vmem:[%s6380_s6 + $0x50] sm:$0xff]  ;;  %v4104_v19 = vld [vmem:[%s6380_s6] sm:$0xff]  ;;  %p4601_p1 = pnand %p4600_p0, %p4806_p5 }
  0x81   : > { %1400 = vmatpush.bf16.msra.mxu3 %v3343_v29  ;;  %v3389_v62 = vor.u32 %v4017_v56, %v3388_v50  ;;  %v3295_v29 = vor.u32 %v4090_v20, %v3292_v21  ;;  %v3348_v50 = vld [vmem:[%s6377_s3] sm:$0xf]  ;;  %v4007_v56 = vld [vmem:[%s6377_s3 + $0x4] sm:$0xf0]  ;;  %v3279_v51 = vor.u32 %v4086_v44, %v3276_v46 }
  0x82   : > { %1368 = vmatpush.bf16.msra.mxu0 %v3263_v38  ;;  %1362 = vmatmul.bf16.vlgmr.msra.gmra.mxu1 %v5139_v55  ;;  %v3380_v55 = vld [vmem:[%s6377_s3 + $0x40] sm:$0xf]  ;;  %v4009_v38 = vld [vmem:[%s6377_s3 + $0x14] sm:$0xf0]  ;;  %v3349_v7 = vor.u32 %v4007_v56, %v3348_v50  ;;  %v4125_v34 = vld [vmem:[%s6382_s8 + $0x28] sm:$0xff]  ;;  %p4602_p2 = pneg %p4601_p1 }
  0x83   : > { %1486 = vmatpush.bf16.msrb.mxu1 %v3405_v36  ;;  %v3381_v10 = vor.u32 %v4015_v1, %v3380_v55  ;;  %v3369_v36 = vor.u32 %v4010_v27, %v3366_v30  ;;  %v4119_v1 = vld [vmem:[%s6380_s6 + $0x78] sm:$0xff] }
  0x84   : > { %1381 = vmatpush.bf16.msra.mxu2 %v3327_v42  ;;  %v4070_v42 = vld [vmem:[%s6378_s4 + $0x184] sm:$0xf]  ;;  %v4127_v30 = vld [vmem:[%s6382_s8 + $0x38] sm:$0xff] }
  0x85   : > { %1499 = vmatpush.bf16.msrb.mxu3 %v3409_v37  ;;  %v3223_v37 = vor.u32 %v4072_v31, %v3220_v32  ;;  %v4126_v31 = vld [vmem:[%s6382_s8 + $0x30] sm:$0xff] }
  0x86   : > { %1369 = vmatpush.bf16.msra.mxu0 %v3255_v53  ;;  %v3350_v53 = vld [vmem:[%s6377_s3 + $0x8] sm:$0xf0] }
  0x87   : > { %1487 = vmatpush.bf16.msrb.mxu1 %v3397_v49  ;;  %v3215_v49 = vor.u32 %v4070_v42, %v3212_v43 }
  0x88   : > { %1382 = vmatpush.bf16.msra.mxu2 %v3319_v58 }
  0x89   : > { %1500 = vmatpush.bf16.msrb.mxu3 %v3401_v52  ;;  %v4006_v52 = vld [vmem:[%s6377_s3 + $0x4] sm:$0xf] }
  0x8a   : > { %1370 = vmatpush.bf16.msra.mxu0 %v3247_v0  ;;  %v3353_v58 = vor.u32 %v4006_v52, %v3350_v53  ;;  %v4111_v0 = vld [vmem:[%s6380_s6 + $0x38] sm:$0xff] }
  0x8b   : > { %1488 = vmatpush.bf16.msrb.mxu1 %v3389_v62 }
  0x8c   : > { %1383 = vmatpush.bf16.msra.mxu2 %v3311_v3 }
  0x8d   : > { %1501 = vmatpush.bf16.msrb.mxu3 %v3393_v63 }
  0x8e   : > { %1371 = vmatpush.bf16.msra.mxu0 %v3239_v12  ;;  %v4116_v12 = vld [vmem:[%s6380_s6 + $0x60] sm:$0xff] }
  0x8f   : > { %1489 = vmatpush.bf16.msrb.mxu1 %v3381_v10  ;;  %v4107_v10 = vld [vmem:[%s6380_s6 + $0x18] sm:$0xff] }
  0x90   : > { %1384 = vmatpush.bf16.msra.mxu2 %v3303_v16  ;;  %3345 = vmatmul.msk.bf16.vlgmr.msra.gmra.mxu3 %vm1246_vm0, %v5249_v45  ;;  %v3356_v45 = vld [vmem:[%s6377_s3 + $0x10] sm:$0xf]  ;;  %v4105_v16 = vld [vmem:[%s6380_s6 + $0x8] sm:$0xff] }
  0x91   : > { %1502 = vmatpush.bf16.msrb.mxu3 %v3385_v11  ;;  %v3357_v47 = vor.u32 %v4009_v38, %v3356_v45 }
  0x92   : > { %1372 = vmatpush.bf16.msra.mxu0 %v3231_v24 }
  0x93   : > { %1490 = vmatpush.bf16.msrb.mxu1 %v3373_v22 }
  0x94   : > { %1385 = vmatpush.bf16.msra.mxu2 %v3295_v29 }
  0x95   : > { %1503 = vmatpush.bf16.msrb.mxu3 %v3377_v23  ;;  %v4113_v23 = vld [vmem:[%s6380_s6 + $0x48] sm:$0xff] }
  0x96   : > { %1373 = vmatpush.bf16.msra.mxu0 %v3223_v37  ;;  %v1512_v37 = vld [vmem:[#allocation2] sm:$0x3] }
  0x97   : > { %1491 = vmatpush.bf16.msrb.mxu1 %v3365_v35  ;;  %v1514_v41 = vperm.slane %v1512_v37, 0 }
  0x98   : > { %1386 = vmatpush.bf16.msra.mxu2 %v3287_v40 }
  0x99   : > { %1504 = vmatpush.bf16.msrb.mxu3 %v3369_v36 }
  0x9a   : > { %1374 = vmatpush.bf16.msra.mxu0 %v3215_v49 }
  0x9b   : > { %1492 = vmatpush.bf16.msrb.mxu1 %v3357_v47 }
  0x9c   : > { %1387 = vmatpush.bf16.msra.mxu2 %v3279_v51 }
  0x9d   : > { %1505 = vmatpush.bf16.msrb.mxu3 %v3361_v48  ;;  %1375 = vmatmul.bf16.vlgmr.msra.gmra.mxu0 %v5143_v57  ;;  %v4110_v57 = vld [vmem:[%s6380_s6 + $0x30] sm:$0xff] }
  0x9e   : > { %1656 = vmatpush.bf16.msrb.mxu0 %v4111_v0 }
  0x9f   : > { %1493 = vmatpush.bf16.msrb.mxu1 %v3349_v7  ;;  %1388 = vmatmul.bf16.vlgmr.msra.gmra.mxu2 %v5335_v28  ;;  %v1515_v7 = vperm.slane %v1512_v37, 1  ;;  %v3615_v37 = vld [vmem:[%s6387_s13 + $0x78] sm:$0xf0] }
  0xa0   : > { %1669 = vmatpush.bf16.msrb.mxu2 %v4119_v1  ;;  %v4121_v1 = vld [vmem:[%s6382_s8 + $0x8] sm:$0xff] }
  0xa1   : > { %1506 = vmatpush.bf16.msrb.mxu3 %v3353_v58 }
  0xa2   : > { %1494 = vmatmul.bf16.vlgmr.msrb.gmra.mxu1 %v5521_v59  ;;  %1657 = vmatpush.bf16.msrb.mxu0 %v4110_v57  ;;  %v4123_v57 = vld [vmem:[%s6382_s8 + $0x18] sm:$0xff] }
  0xa3   : > { %1752 = vmatpush.bf16.msra.mxu1 %v4127_v30  ;;  %v4132_v30 = vld [vmem:[%s6385_s11] sm:$0xff] }
  0xa4   : > { %1507 = vmatmul.bf16.vlgmr.msrb.gmra.mxu3 %v5521_v59  ;;  %1670 = vmatpush.bf16.msrb.mxu2 %v4118_v4 }
  0xa6   : > { %1658 = vmatpush.bf16.msrb.mxu0 %v4109_v2  ;;  %v4120_v2 = vld [vmem:[%s6382_s8] sm:$0xff] }
  0xa7   : > { %1753 = vmatpush.bf16.msra.mxu1 %v4126_v31 }
  0xa8   : > { %1671 = vmatpush.bf16.msrb.mxu2 %v4117_v9 }
  0xaa   : > { %1659 = vmatpush.bf16.msrb.mxu0 %v4108_v8 }
  0xab   : > { %1754 = vmatpush.bf16.msra.mxu1 %v4125_v34  ;;  %v4155_v34 = vld [vmem:[%s6387_s13 + $0x74] sm:$0xf0] }
  0xac   : > { %1672 = vmatpush.bf16.msrb.mxu2 %v4116_v12 }
  0xae   : > { %1660 = vmatpush.bf16.msrb.mxu0 %v4107_v10 }
  0xb0   : > { %1673 = vmatpush.bf16.msrb.mxu2 %v4115_v15  ;;  %v4131_v15 = vld [vmem:[#allocation8 + $0x18] sm:$0xff] }
  0xb2   : > { %1661 = vmatpush.bf16.msrb.mxu0 %v4106_v13  ;;  %v4139_v13 = vld [vmem:[%s6385_s11 + $0x38] sm:$0xff] }
  0xb3   : > { %1849 = vmatpush.bf16.msra.mxu3 %v4139_v13  ;;  %v4142_v13 = vld [vmem:[%s6387_s13 + $0x14] sm:$0xf] }
  0xb4   : > { %1674 = vmatpush.bf16.msrb.mxu2 %v4114_v18  ;;  %v4129_v18 = vld [vmem:[#allocation8 + $0x8] sm:$0xff] }
  0xb6   : > { %1662 = vmatpush.bf16.msrb.mxu0 %v4105_v16  ;;  %v4130_v16 = vld [vmem:[#allocation8 + $0x10] sm:$0xff] }
  0xb8   : > { %1675 = vmatpush.bf16.msrb.mxu2 %v4113_v23  ;;  %v4134_v23 = vld [vmem:[%s6385_s11 + $0x10] sm:$0xff] }
  0xba   : > { %1663 = vmatpush.bf16.msrb.mxu0 %v4104_v19  ;;  %v4136_v19 = vld [vmem:[%s6385_s11 + $0x20] sm:$0xff] }
  0xbc   : > { %1676 = vmatpush.bf16.msrb.mxu2 %v4112_v25 }
  0xda   : > { %v1259_v61 = vpop.f32.mrf.mxu0 }
  0xdb   : > { %v1272_v60 = vpop.f32.mrf.mxu1 }
  0xdc   : > { %v1273_v29 = vadd.f32 %v1272_v60, %v1259_v61 }
  0xe2   : > { %v1285_v62 = vpop.f32.mrf.mxu2  ;;  %v1261_v28 = vpop.f32.mrf.mxu0 }
  0xe3   : > { %v1298_v63 = vpop.f32.mrf.mxu3  ;;  %v1274_v55 = vpop.f32.mrf.mxu1  ;;  %v1286_v32 = vadd.f32 %v1285_v62, %v1273_v29  ;;  %v4122_v28 = vld [vmem:[%s6382_s8 + $0x10] sm:$0xff] }
  0xe4   : > { %v4124_v55 = vld [vmem:[%s6382_s8 + $0x20] sm:$0xff] }
  0xe5   : > { %v1299_v35 = vadd.f32 %v1298_v63, %v1286_v32  ;;  %1755 = vmatpush.bf16.msra.mxu1 %v4124_v55  ;;  %v4128_v32 = vld [vmem:[#allocation8] sm:$0xff] }
  0xe6   : > { %v4145_v55 = vld [vmem:[%s6387_s13 + $0x24] sm:$0xf0] }
  0xe9   : > { %1756 = vmatpush.bf16.msra.mxu1 %v4123_v57  ;;  %v4144_v57 = vld [vmem:[%s6387_s13 + $0x24] sm:$0xf] }
  0xea   : > { %v1287_v3 = vpop.f32.mrf.mxu2 }
  0xeb   : > { %v1300_v5 = vpop.f32.mrf.mxu3  ;;  %v1324_v6 = vpop.f32.mrf.mxu1 }
  0xec   : > { %v4368_v5 = vld [vmem:[#allocation5] ss:$0 sm:$0xff] }
  0xed   : > { %1757 = vmatpush.bf16.msra.mxu1 %v4122_v28  ;;  %v3575_v28 = vld [vmem:[%s6387_s13 + $0x28] sm:$0xf0] }
  0xf1   : > { %1758 = vmatpush.bf16.msra.mxu1 %v4121_v1 }
  0xf3   : > { %v1326_v11 = vpop.f32.mrf.mxu1 }
  0xf5   : > { %1759 = vmatpush.bf16.msra.mxu1 %v4120_v2  ;;  %v3578_v2 = vor.u32 %v4144_v57, %v3575_v28  ;;  %v4183_v28 = vld [vmem:[%s6389_s15 + $0xd4] sm:$0xf0] }
  0xf9   : > { %1894 = vmatpush.bf16.msrb.mxu1 %v4131_v15  ;;  %v3567_v15 = vld [vmem:[%s6387_s13 + $0x18] sm:$0xf0] }
  0xfa   : > { %v1311_v14 = vpop.f32.mrf.mxu0 }
  0xfb   : > { %v1312_v36 = vadd.f32 %v1311_v14, %v1299_v35  ;;  %v4138_v14 = vld [vmem:[%s6385_s11 + $0x30] sm:$0xff] }
  0xfc   : > { %1850 = vmatpush.bf16.msra.mxu3 %v4138_v14  ;;  %v4154_v35 = vld [vmem:[%s6387_s13 + $0x74] sm:$0xf] }
  0xfd   : > { %v1325_v40 = vadd.f32 %v1324_v6, %v1312_v36  ;;  %1895 = vmatpush.bf16.msrb.mxu1 %v4130_v16  ;;  %v3570_v16 = vor.u32 %v4142_v13, %v3567_v15  ;;  %v4174_v15 = vld [vmem:[%s6389_s15 + $0x94] sm:$0xf] }
  0xff   : > { %v1363_v17 = vpop.f32.mrf.mxu1 }
 0x101   : > { %1896 = vmatpush.bf16.msrb.mxu1 %v4129_v18  ;;  %v4141_v18 = vld [vmem:[%s6387_s13 + $0x4] sm:$0xf0] }
 0x102   : > { %v1337_v21 = vpop.f32.mrf.mxu2  ;;  %v1313_v22 = vpop.f32.mrf.mxu0 }
 0x103   : > { %v1350_v20 = vpop.f32.mrf.mxu3 }
 0x104   : > { %v1351_v45 = vadd.f32 %v1350_v20, %v1337_v21  ;;  %v4135_v20 = vld [vmem:[%s6385_s11 + $0x18] sm:$0xff]  ;;  %v4369_v21 = vld [vmem:[#allocation7] ss:$0 sm:$0xff] }
 0x105   : > { %1897 = vmatpush.bf16.msrb.mxu1 %v4128_v32  ;;  %v4240_v32 = vld [vmem:[%s6389_s15 + $0x2a4] sm:$0xf] }
 0x106   : > { %v1364_v43 = vadd.f32 %v1363_v17, %v1351_v45  ;;  %v4137_v17 = vld [vmem:[%s6385_s11 + $0x28] sm:$0xff] }
 0x107   : > { %v1365_v24 = vpop.f32.mrf.mxu1  ;;  %1851 = vmatpush.bf16.msra.mxu3 %v4137_v17  ;;  %v4153_v45 = vld [vmem:[%s6387_s13 + $0x64] sm:$0xf0]  ;;  %v3557_v17 = vld [vmem:[%s6387_s13] sm:$0xf] }
 0x10a   : > { %v1339_v27 = vpop.f32.mrf.mxu2 }
 0x10b   : > { %v1352_v26 = vpop.f32.mrf.mxu3  ;;  %1852 = vmatpush.bf16.msra.mxu3 %v4136_v19  ;;  %v4140_v19 = vld [vmem:[%s6387_s13 + $0x4] sm:$0xf] }
 0x10c   : > { %v4133_v26 = vld [vmem:[%s6385_s11 + $0x8] sm:$0xff] }
 0x10f   : > { %1853 = vmatpush.bf16.msra.mxu3 %v4135_v20  ;;  %v3558_v20 = vor.u32 %v4141_v18, %v3557_v17  ;;  %v3861_v18 = vld [vmem:[%s6389_s15 + $0x1e0] sm:$0xf] }
 0x113   : > { %v1402_v33 = vpop.f32.mrf.mxu3  ;;  %1854 = vmatpush.bf16.msra.mxu3 %v4134_v23  ;;  %v3981_v23 = vld [vmem:[%s6389_s15 + $0x2d0] sm:$0xf] }
 0x117   : > { %1855 = vmatpush.bf16.msra.mxu3 %v4133_v26 }
 0x11a   : > { %v1376_v38 = vpop.f32.mrf.mxu0 }
 0x11b   : > { %v1404_v39 = vpop.f32.mrf.mxu3  ;;  %v1377_v46 = vadd.f32 %v1376_v38, %v1364_v43  ;;  %1856 = vmatpush.bf16.msra.mxu3 %v4132_v30  ;;  %v3618_v38 = vor.u32 %v4154_v35, %v3615_v37  ;;  %v3597_v43 = vld [vmem:[%s6387_s13 + $0x50] sm:$0xf]  ;;  %v4243_v30 = vld [vmem:[%s6389_s15 + $0x2b4] sm:$0xf0]  ;;  %v4198_v37 = vld [vmem:[%s6389_s15 + $0x154] sm:$0xf] }
 0x11c   : > { %v4152_v39 = vld [vmem:[%s6387_s13 + $0x64] sm:$0xf] }
 0x11d   : > { %2025 = vmatpush.bf16.msra.mxu0 %v3618_v38 }
 0x11e   : > { %1857 = vmatmul.bf16.vlgmr.msra.gmra.mxu3 %v5521_v59  ;;  %v3605_v59 = vld [vmem:[%s6387_s13 + $0x60] sm:$0xf] }
 0x11f   : > { %v1495_v42 = vpop.f32.mrf.mxu1 }
 0x120   : > { %v1496_v44 = vadd.f32 %v1495_v42, %v1325_v40  ;;  %v3607_v40 = vld [vmem:[%s6387_s13 + $0x68] sm:$0xf0] }
 0x121   : > { %v3610_v42 = vor.u32 %v4152_v39, %v3607_v40  ;;  %v3933_v40 = vld [vmem:[%s6389_s15 + $0x270] sm:$0xf] }
 0x122   : > { %v1518_v47 = vadd.f32 %v1514_v41, %v1496_v44  ;;  %v1389_v48 = vpop.f32.mrf.mxu2  ;;  %v1378_v56 = vpop.f32.mrf.mxu0  ;;  %v3606_v41 = vor.u32 %v4153_v45, %v3605_v59  ;;  %v4151_v44 = vld [vmem:[%s6387_s13 + $0x54] sm:$0xf0]  ;;  %v3791_v59 = vld [vmem:[%s6389_s15 + $0x168] sm:$0xf0] }
 0x123   : > { %v1390_v50 = vadd.f32 %v1389_v48, %v1377_v46  ;;  %v4150_v46 = vld [vmem:[%s6387_s13 + $0x54] sm:$0xf]  ;;  %v3598_v48 = vor.u32 %v4151_v44, %v3597_v43  ;;  %2026 = vmatpush.bf16.msra.mxu0 %v3610_v42  ;;  %v4149_v56 = vld [vmem:[%s6387_s13 + $0x44] sm:$0xf0]  ;;  %v3794_v39 = vor.u32 %v4198_v37, %v3791_v59  ;;  %v3935_v43 = vld [vmem:[%s6389_s15 + $0x288] sm:$0xf0] }
 0x124   : > { %v1520_v49 = vmax.f32 %v1518_v47, 0.0  ;;  %v3599_v47 = vld [vmem:[%s6387_s13 + $0x58] sm:$0xf0]  ;;  %v4234_v42 = vld [vmem:[%s6389_s15 + $0x274] sm:$0xf] }
 0x125   : > { %v1403_v52 = vadd.f32 %v1402_v33, %v1390_v50  ;;  %v3613_v33 = vld [vmem:[%s6387_s13 + $0x70] sm:$0xf]  ;;  %v3589_v50 = vld [vmem:[%s6387_s13 + $0x40] sm:$0xf] }
 0x126   : > { %v1522_v51 = vpack.c.bf16 %v1520_v49, %v1520_v49  ;;  %v3614_v36 = vor.u32 %v4155_v34, %v3613_v33  ;;  %v3602_v49 = vor.u32 %v4150_v46, %v3599_v47  ;;  %v3959_v33 = vld [vmem:[%s6389_s15 + $0x2b8] sm:$0xf0]  ;;  %v3789_v34 = vld [vmem:[%s6389_s15 + $0x150] sm:$0xf]  ;;  %v3765_v44 = vld [vmem:[%s6389_s15 + $0x120] sm:$0xf] }
 0x127   : > { %v1508_v53 = vpop.f32.mrf.mxu3  ;;  %v1497_v54 = vpop.f32.mrf.mxu1  ;;  %v3962_v45 = vor.u32 %v4240_v32, %v3959_v33  ;;  %v4195_v46 = vld [vmem:[%s6389_s15 + $0x134] sm:$0xf0]  ;;  %v4213_v32 = vld [vmem:[%s6389_s15 + $0x1c4] sm:$0xf0]  ;;  %v4210_v33 = vld [vmem:[%s6389_s15 + $0x1b4] sm:$0xf] }
 0x128   : > { %v1509_v58 = vadd.f32 %v1508_v53, %v1403_v52  ;;  %1664 = vmatmul.bf16.vlgmr.msrb.gmra.mxu0 %v1522_v51  ;;  %2012 = vmatpush.bf16.msra.mxu2 %v3614_v36  ;;  %v4148_v51 = vld [vmem:[%s6387_s13 + $0x44] sm:$0xf]  ;;  %v3591_v52 = vld [vmem:[%s6387_s13 + $0x48] sm:$0xf0]  ;;  %v3590_v53 = vor.u32 %v4149_v56, %v3589_v50  ;;  %v3581_v54 = vld [vmem:[%s6387_s13 + $0x30] sm:$0xf]  ;;  %v3766_v47 = vor.u32 %v4195_v46, %v3765_v44 }
 0x129   : > { %2027 = vmatpush.bf16.msra.mxu0 %v3602_v49  ;;  %v4201_v36 = vld [vmem:[%s6389_s15 + $0x164] sm:$0xf0]  ;;  %v3767_v49 = vld [vmem:[%s6389_s15 + $0x138] sm:$0xf0]  ;;  %v3645_v59 = vld [vmem:[%s6389_s15 + $0x30] sm:$0xf] }
 0x12a   : > { %v1519_v60 = vadd.f32 %v1515_v7, %v1509_v58  ;;  %v1391_v61 = vpop.f32.mrf.mxu2  ;;  %v3594_v7 = vor.u32 %v4148_v51, %v3591_v52  ;;  %v4147_v58 = vld [vmem:[%s6387_s13 + $0x34] sm:$0xf0]  ;;  %v3790_v38 = vor.u32 %v4201_v36, %v3789_v34  ;;  %v3909_v51 = vld [vmem:[%s6389_s15 + $0x240] sm:$0xf]  ;;  %v3839_v34 = vld [vmem:[%s6389_s15 + $0x1c8] sm:$0xf0] }
 0x12b   : > { %v3583_v61 = vld [vmem:[%s6387_s13 + $0x38] sm:$0xf0]  ;;  %v4231_v52 = vld [vmem:[%s6389_s15 + $0x254] sm:$0xf0]  ;;  %v3813_v44 = vld [vmem:[%s6389_s15 + $0x180] sm:$0xf] }
 0x12c   : > { %v1521_v62 = vmax.f32 %v1519_v60, 0.0  ;;  %2013 = vmatpush.bf16.msra.mxu2 %v3606_v41  ;;  %v4146_v60 = vld [vmem:[%s6387_s13 + $0x34] sm:$0xf]  ;;  %v4237_v41 = vld [vmem:[%s6389_s15 + $0x284] sm:$0xf0]  ;;  %v3910_v57 = vor.u32 %v4231_v52, %v3909_v51 }
 0x12d   : > { %2028 = vmatpush.bf16.msra.mxu0 %v3594_v7  ;;  %v3934_v50 = vor.u32 %v4237_v41, %v3933_v40  ;;  %v3741_v7 = vld [vmem:[%s6389_s15 + $0xf0] sm:$0xf]  ;;  %v4162_v40 = vld [vmem:[%s6389_s15 + $0x34] sm:$0xf]  ;;  %v3647_v41 = vld [vmem:[%s6389_s15 + $0x48] sm:$0xf0] }
 0x12e   : > { %v1523_v63 = vpack.c.bf16 %v1521_v62, %v1521_v62  ;;  %v3582_v62 = vor.u32 %v4147_v58, %v3581_v54  ;;  %v4189_v54 = vld [vmem:[%s6389_s15 + $0x104] sm:$0xf0]  ;;  %v4186_v58 = vld [vmem:[%s6389_s15 + $0xf4] sm:$0xf]  ;;  %v4207_v46 = vld [vmem:[%s6389_s15 + $0x194] sm:$0xf0] }
 0x12f   : > { %v1510_v0 = vpop.f32.mrf.mxu3  ;;  %v3991_v51 = vld [vmem:[%s6389_s15 + $0x2f0] sm:$0xf0] }
 0x130   : > { %1677 = vmatmul.bf16.vlgmr.msrb.gmra.mxu2 %v1523_v63  ;;  %v3586_v63 = vor.u32 %v4146_v60, %v3583_v61  ;;  %v3573_v0 = vld [vmem:[%s6387_s13 + $0x20] sm:$0xf]  ;;  %v4228_v60 = vld [vmem:[%s6389_s15 + $0x244] sm:$0xf]  ;;  %v3911_v61 = vld [vmem:[%s6389_s15 + $0x258] sm:$0xf0] }
 0x131   : > { %2014 = vmatpush.bf16.msra.mxu2 %v3598_v48  ;;  %v3574_v1 = vor.u32 %v4145_v55, %v3573_v0  ;;  %v4192_v48 = vld [vmem:[%s6389_s15 + $0x124] sm:$0xf]  ;;  %v3717_v55 = vld [vmem:[%s6389_s15 + $0xc0] sm:$0xf] }
 0x132   : > { %2029 = vmatpush.bf16.msra.mxu0 %v3586_v63  ;;  %v3770_v56 = vor.u32 %v4192_v48, %v3767_v49  ;;  %v3742_v63 = vor.u32 %v4189_v54, %v3741_v7  ;;  %v3815_v48 = vld [vmem:[%s6389_s15 + $0x198] sm:$0xf0]  ;;  %v4250_v49 = vld [vmem:[%s6389_s15 + $0x2ec] sm:$0xf0]  ;;  %v3621_v7 = vld [vmem:[%s6389_s15] sm:$0xf]  ;;  %v3814_v54 = vor.u32 %v4207_v46, %v3813_v44 }
 0x133   : > { %v3893_v44 = vld [vmem:[%s6389_s15 + $0x218] sm:$0xf]  ;;  %v4226_v46 = vld [vmem:[%s6389_s15 + $0x22c] sm:$0xf0] }
 0x135   : > { %2015 = vmatpush.bf16.msra.mxu2 %v3590_v53  ;;  %v3938_v53 = vor.u32 %v4234_v42, %v3935_v43  ;;  %v3842_v43 = vor.u32 %v4210_v33, %v3839_v34  ;;  %v3917_v34 = vld [vmem:[%s6389_s15 + $0x248] sm:$0xf] }
 0x136   : > { %2030 = vmatpush.bf16.msra.mxu0 %v3578_v2  ;;  %v3719_v2 = vld [vmem:[%s6389_s15 + $0xd8] sm:$0xf0] }
 0x139   : > { %2016 = vmatpush.bf16.msra.mxu2 %v3582_v62  ;;  %v3743_v62 = vld [vmem:[%s6389_s15 + $0x108] sm:$0xf0] }
 0x13a   : > { %2031 = vmatpush.bf16.msra.mxu0 %v3570_v16  ;;  %v3746_v0 = vor.u32 %v4186_v58, %v3743_v62  ;;  %v3695_v16 = vld [vmem:[%s6389_s15 + $0xa8] sm:$0xf0]  ;;  %v4159_v58 = vld [vmem:[%s6389_s15 + $0x14] sm:$0xf0] }
 0x13d   : > { %2017 = vmatpush.bf16.msra.mxu2 %v3574_v1  ;;  %v4180_v1 = vld [vmem:[%s6389_s15 + $0xc4] sm:$0xf] }
 0x1a5   : > { %v1665_v3 = vpop.f32.mrf.mxu0 }
 0x1a6   : > { %v1666_v6 = vadd.f32 %v4368_v5, %v1665_v3  ;;  %v1769_v3 = vld [vmem:[%s718_s26] sm:$0xff]  ;;  %s4603_s26 = scalar_lea.hbm %s6424_s10, 192 }
 0x1a7   : > { %p4605_p4 = scmp.lt.s32.totalorder %s4603_s26, %s4599_s19 }
 0x1a9   : > { %p4606_p7 = por %p4605_p4, %p4604_p3 }
 0x1ab   : > { %p4607_p8 = pnand %p4606_p7, %p4602_p2 }
 0x1ad   : > { %v1667_v4 = vpop.f32.mrf.mxu0 }
 0x1b3   : > { %v1678_v8 = vpop.f32.mrf.mxu2 }
 0x1b4   : > { %v1679_v9 = vadd.f32 %v1678_v8, %v1666_v6 }
 0x1b6   : > { %v1682_v10 = vmax.f32 %v1679_v9, 0.0  ;;  %v5709_v9 = vpop.f32.mrf.mxu3 }
 0x1b8   : > { %v1683_v11 = vpack.c.bf16 %v1682_v10, %v1682_v10 }
 0x1ba   : > { %1760 = vmatmul.bf16.vlgmr.msra.gmra.mxu1 %v1683_v11  ;;  %v3565_v11 = vld [vmem:[%s6387_s13 + $0x10] sm:$0xf] }
 0x1bb   : > { %v1680_v12 = vpop.f32.mrf.mxu2  ;;  %2632 = vmatpush.bf16.msra.mxu1 %v3790_v38 }
 0x1bc   : > { %v4143_v12 = vld [vmem:[%s6387_s13 + $0x14] sm:$0xf0] }
 0x1bd   : > { %v3566_v14 = vor.u32 %v4143_v12, %v3565_v11  ;;  %v3722_v11 = vor.u32 %v4180_v1, %v3719_v2  ;;  %v3693_v12 = vld [vmem:[%s6389_s15 + $0x90] sm:$0xf]  ;;  %v3799_v1 = vld [vmem:[%s6389_s15 + $0x170] sm:$0xf0] }
 0x1be   : > { %v1860_v10 = vpop.f32.mrf.mxu3 }
 0x1bf   : > { %2018 = vmatpush.bf16.msra.mxu2 %v3566_v14  ;;  %2633 = vmatpush.bf16.msra.mxu1 %v3766_v47  ;;  %v3718_v10 = vor.u32 %v4183_v28, %v3717_v55  ;;  %v4177_v14 = vld [vmem:[%s6389_s15 + $0xa4] sm:$0xf0]  ;;  %v4204_v47 = vld [vmem:[%s6389_s15 + $0x184] sm:$0xf]  ;;  %v4199_v28 = vld [vmem:[%s6389_s15 + $0x15c] sm:$0xf] }
 0x1c0   : > { %v3818_v55 = vor.u32 %v4204_v47, %v3815_v48  ;;  %v4223_v47 = vld [vmem:[%s6389_s15 + $0x21c] sm:$0xf]  ;;  %v3895_v48 = vld [vmem:[%s6389_s15 + $0x230] sm:$0xf0] }
 0x1c3   : > { %2019 = vmatpush.bf16.msra.mxu2 %v3558_v20  ;;  %2634 = vmatpush.bf16.msra.mxu1 %v3742_v63  ;;  %v4216_v20 = vld [vmem:[%s6389_s15 + $0x1e4] sm:$0xf]  ;;  %v3797_v63 = vld [vmem:[%s6389_s15 + $0x158] sm:$0xf] }
 0x1c7   : > { %2658 = vmatpush.bf16.msrb.mxu2 %v3794_v39  ;;  %2635 = vmatpush.bf16.msra.mxu1 %v3718_v10  ;;  %v4165_v39 = vld [vmem:[%s6389_s15 + $0x44] sm:$0xf0]  ;;  %v4241_v10 = vld [vmem:[%s6389_s15 + $0x2ac] sm:$0xf] }
 0x1c8   : > { %v3646_v52 = vor.u32 %v4165_v39, %v3645_v59  ;;  %v4184_v39 = vld [vmem:[%s6389_s15 + $0xdc] sm:$0xf0] }
 0x1cb   : > { %2659 = vmatpush.bf16.msrb.mxu2 %v3770_v56  ;;  %v4247_v56 = vld [vmem:[%s6389_s15 + $0x2dc] sm:$0xf] }
 0x1cf   : > { %2660 = vmatpush.bf16.msrb.mxu2 %v3746_v0  ;;  %v4202_v0 = vld [vmem:[%s6389_s15 + $0x16c] sm:$0xf0] }
 0x1d3   : > { %2661 = vmatpush.bf16.msrb.mxu2 %v3722_v11  ;;  %v3967_v11 = vld [vmem:[%s6389_s15 + $0x2c0] sm:$0xf0] }
 0x237   : > { %v1761_v22 = vpop.f32.mrf.mxu1 }
 0x238   : > { %v5621_v24 = vadd.f32 %v4369_v21, %v1761_v22  ;;  %v3559_v21 = vld [vmem:[%s6387_s13 + $0x8] sm:$0xf0] }
 0x239   : > { %v3562_v22 = vor.u32 %v4140_v19, %v3559_v21  ;;  %v4219_v19 = vld [vmem:[%s6389_s15 + $0x1f4] sm:$0xf0]  ;;  %v3863_v21 = vld [vmem:[%s6389_s15 + $0x1f8] sm:$0xf0] }
 0x23a   : > { %1765 = vst [vmem:[%s722_s27] sm:$0xff] %v5621_v24  ;;  %v1766_v25 = vmul.f32 0.5, %v5621_v24  ;;  %s697_s27 = sand.u32 1, %s4653_s28  }
 0x23b   : > { %2032 = vmatpush.bf16.msra.mxu0 %v3562_v22  ;;  %v3694_v22 = vor.u32 %v4177_v14, %v3693_v12  ;;  %v3802_v14 = vor.u32 %v4199_v28, %v3799_v1  ;;  %v4214_v28 = vld [vmem:[%s6389_s15 + $0x1cc] sm:$0xf0]  ;;  %v4211_v1 = vld [vmem:[%s6389_s15 + $0x1bc] sm:$0xf]  ;;  %s4252_s20 = smul.u32 48, %s697_s27  ;;  %s2795_s0 = scalar_lea.sflag [#allocation4], %s697_s27 }
 0x23c   : > { %v1767_v27 = vmul.f32 1.442695, %v1766_v25  ;;  %v4246_v25 = vld [vmem:[%s6389_s15 + $0x2d4] sm:$0xf] }
 0x23d   : > { %2636 = vmatpush.bf16.msra.mxu1 %v3694_v22  ;;  %v4238_v22 = vld [vmem:[%s6389_s15 + $0x28c] sm:$0xf0]  ;;  %s6331_s17 = scalar_lea.vmem [#allocation14], %s4252_s20 }
 0x23e   : > { %4371 = vpow2.f32 %v1767_v27  ;;  %v3983_v27 = vld [vmem:[%s6389_s15 + $0x2e8] sm:$0xf0]  ;;  %s2812_s23 = sshll.u32 %s6331_s17, 4  ;;  %s2813_s23 = int_to_ptr.vmem [resolvable:$true] %s2812_s23 }
 0x23f   : > { %v1763_v29 = vpop.f32.mrf.mxu1 }
 0x240   : > { %v3957_v29 = vld [vmem:[%s6389_s15 + $0x2a0] sm:$0xf] }
 0x241   : > { %v3958_v35 = vor.u32 %v4243_v30, %v3957_v29  ;;  %v3671_v29 = vld [vmem:[%s6389_s15 + $0x78] sm:$0xf0]  ;;  %v3866_v30 = vor.u32 %v4216_v20, %v3863_v21  ;;  %v3970_v20 = vor.u32 %v4241_v10, %v3967_v11  ;;  %v3941_v21 = vld [vmem:[%s6389_s15 + $0x278] sm:$0xf]  ;;  %v3679_v11 = vld [vmem:[%s6389_s15 + $0x80] sm:$0xf0] }
 0x244   : > { %v4372_v31 = vpop.eup %4371 }
 0x245   : > { %1771 = vrot.lane.b32.xlu0 %v4372_v31, %s4672_s22  ;;  %v3986_v31 = vor.u32 %v4246_v25, %v3983_v27  ;;  %v3862_v25 = vor.u32 %v4219_v19, %v3861_v18  ;;  %v4168_v27 = vld [vmem:[%s6389_s15 + $0x64] sm:$0xf]  ;;  %v4193_v18 = vld [vmem:[%s6389_s15 + $0x12c] sm:$0xf] }
 0x246   : > { %v3674_v37 = vor.u32 %v4168_v27, %v3671_v29  ;;  %v3775_v19 = vld [vmem:[%s6389_s15 + $0x140] sm:$0xf0]  ;;  %v3749_v27 = vld [vmem:[%s6389_s15 + $0xf8] sm:$0xf]  ;;  %v4190_v29 = vld [vmem:[%s6389_s15 + $0x10c] sm:$0xf0] }
 0x247   : > { %2671 = vmatpush.bf16.msrb.mxu0 %v3986_v31  ;;  %v3837_v31 = vld [vmem:[%s6389_s15 + $0x1b0] sm:$0xf]  ;;  %v3750_v59 = vor.u32 %v4190_v29, %v3749_v27  ;;  %v4157_v29 = vld [vmem:[%s6389_s15 + $0xc] sm:$0xf] }
 0x248   : > { %v3838_v38 = vor.u32 %v4213_v32, %v3837_v31  ;;  %v4187_v31 = vld [vmem:[%s6389_s15 + $0xfc] sm:$0xf]  ;;  %v3751_v32 = vld [vmem:[%s6389_s15 + $0x110] sm:$0xf0] }
 0x24b   : > { %2672 = vmatpush.bf16.msrb.mxu0 %v3962_v45 }
 0x24f   : > { %2673 = vmatpush.bf16.msrb.mxu0 %v3938_v53  ;;  %v3650_v53 = vor.u32 %v4162_v40, %v3647_v41  ;;  %v4181_v41 = vld [vmem:[%s6389_s15 + $0xcc] sm:$0xf] }
 0x2b7   : > { %v1772_v4 = vpop.permute.xlu0 %1771 }
 0x2b8   : > { %v1774_v5 = vmul.f32 %v1772_v4, %v1769_v3  ;;  %v3914_v3 = vor.u32 %v4228_v60, %v3911_v61  ;;  %v3885_v4 = vld [vmem:[%s6389_s15 + $0x210] sm:$0xf]  ;;  %v4156_v60 = vld [vmem:[%s6389_s15 + $0x4] sm:$0xf]  ;;  %v3623_v61 = vld [vmem:[%s6389_s15 + $0x18] sm:$0xf0] }
 0x2b9   : > { %v3626_v12 = vor.u32 %v4156_v60, %v3623_v61  ;;  %v3701_v60 = vld [vmem:[%s6389_s15 + $0x98] sm:$0xf]  ;;  %v4178_v61 = vld [vmem:[%s6389_s15 + $0xac] sm:$0xf0] }
 0x2ba   : > { %v1775_v6 = vadd.f32 %v1774_v5, %v5621_v24  ;;  %v4249_v24 = vld [vmem:[%s6389_s15 + $0x2e4] sm:$0xf0]  ;;  %2674 = vmatpush.bf16.msrb.mxu0 %v3914_v3  ;;  %v3994_v3 = vor.u32 %v4247_v56, %v3991_v51  ;;  %v3898_v56 = vor.u32 %v4223_v47, %v3895_v48  ;;  %v3975_v47 = vld [vmem:[%s6389_s15 + $0x2c8] sm:$0xf0] }
 0x2bb   : > { %v3982_v26 = vor.u32 %v4249_v24, %v3981_v23  ;;  %v4225_v5 = vld [vmem:[%s6389_s15 + $0x224] sm:$0xf0]  ;;  %v3698_v23 = vor.u32 %v4174_v15, %v3695_v16  ;;  %v3669_v24 = vld [vmem:[%s6389_s15 + $0x60] sm:$0xf] }
 0x2bc   : > { %v1776_v8 = vpack.c.bf16 %v1775_v6, %v1775_v6  ;;  %v4222_v6 = vld [vmem:[%s6389_s15 + $0x214] sm:$0xf]  ;;  %v3886_v13 = vor.u32 %v4225_v5, %v3885_v4  ;;  %v3965_v4 = vld [vmem:[%s6389_s15 + $0x2a8] sm:$0xf]  ;;  %v4244_v5 = vld [vmem:[%s6389_s15 + $0x2bc] sm:$0xf0] }
 0x2bd   : > { %2645 = vmatpush.bf16.msrb.mxu3 %v3982_v26  ;;  %v4171_v26 = vld [vmem:[%s6389_s15 + $0x74] sm:$0xf0]  ;;  %2662 = vmatpush.bf16.msrb.mxu2 %v3698_v23  ;;  %v3773_v15 = vld [vmem:[%s6389_s15 + $0x128] sm:$0xf]  ;;  %v4196_v16 = vld [vmem:[%s6389_s15 + $0x13c] sm:$0xf0] }
 0x2be   : > { %3554 = vmatmul.msk.bf16.vlgmr.msrb.gmra.mxu1 %vm1886_vm1, %v1776_v8  ;;  %v3887_v8 = vld [vmem:[%s6389_s15 + $0x228] sm:$0xf0]  ;;  %v3670_v36 = vor.u32 %v4171_v26, %v3669_v24  ;;  %v4235_v23 = vld [vmem:[%s6389_s15 + $0x27c] sm:$0xf]  ;;  %v3943_v24 = vld [vmem:[%s6389_s15 + $0x290] sm:$0xf0]  ;;  %v3778_v26 = vor.u32 %v4193_v18, %v3775_v19 }
 0x2bf   : > { %v3890_v17 = vor.u32 %v4222_v6, %v3887_v8  ;;  %v3622_v6 = vor.u32 %v4159_v58, %v3621_v7  ;;  %v3946_v33 = vor.u32 %v4235_v23, %v3943_v24  ;;  %v3869_v51 = vld [vmem:[%s6389_s15 + $0x1e8] sm:$0xf]  ;;  %v3871_v7 = vld [vmem:[%s6389_s15 + $0x200] sm:$0xf0]  ;;  %v3653_v19 = vld [vmem:[%s6389_s15 + $0x38] sm:$0xf] }
 0x2c0   : > { %2637 = vmatpush.bf16.msra.mxu1 %v3670_v36  ;;  %v4229_v36 = vld [vmem:[%s6389_s15 + $0x24c] sm:$0xf]  ;;  %v3655_v23 = vld [vmem:[%s6389_s15 + $0x50] sm:$0xf0] }
 0x2c1   : > { %2646 = vmatpush.bf16.msrb.mxu3 %v3958_v35  ;;  %2675 = vmatpush.bf16.msrb.mxu0 %v3890_v17  ;;  %v4370_v35 = vld [vmem:[#allocation10] ss:$0 sm:$0xff]  ;;  %v3966_v17 = vor.u32 %v4244_v5, %v3965_v4  ;;  %v3677_v5 = vld [vmem:[%s6389_s15 + $0x68] sm:$0xf] }
 0x2c2   : > { %2663 = vmatpush.bf16.msrb.mxu2 %v3674_v37  ;;  %v3919_v37 = vld [vmem:[%s6389_s15 + $0x260] sm:$0xf0] }
 0x2c4   : > { %2638 = vmatpush.bf16.msra.mxu1 %v3646_v52  ;;  %v4220_v52 = vld [vmem:[%s6389_s15 + $0x1fc] sm:$0xf0] }
 0x2c5   : > { %2647 = vmatpush.bf16.msrb.mxu3 %v3934_v50  ;;  %2676 = vmatpush.bf16.msrb.mxu0 %v3866_v30  ;;  %v3942_v30 = vor.u32 %v4238_v22, %v3941_v21  ;;  %v4163_v21 = vld [vmem:[%s6389_s15 + $0x3c] sm:$0xf] }
 0x2c6   : > { %2664 = vmatpush.bf16.msrb.mxu2 %v3650_v53  ;;  %v4217_v53 = vld [vmem:[%s6389_s15 + $0x1ec] sm:$0xf]  ;;  %v3658_v24 = vor.u32 %v4163_v21, %v3655_v23  ;;  %v4227_v21 = vld [vmem:[%s6389_s15 + $0x234] sm:$0xf0]  ;;  %v3903_v23 = vld [vmem:[%s6389_s15 + $0x238] sm:$0xf0] }
 0x2c7   : > { %v3874_v58 = vor.u32 %v4217_v53, %v3871_v7 }
 0x2c8   : > { %2639 = vmatpush.bf16.msra.mxu1 %v3622_v6  ;;  %v4172_v6 = vld [vmem:[%s6389_s15 + $0x7c] sm:$0xf0] }
 0x2c9   : > { %2648 = vmatpush.bf16.msrb.mxu3 %v3910_v57  ;;  %2677 = vmatpush.bf16.msrb.mxu0 %v3842_v43  ;;  %v3922_v43 = vor.u32 %v4229_v36, %v3919_v37  ;;  %v3678_v10 = vor.u32 %v4172_v6, %v3677_v5  ;;  %v4251_v37 = vld [vmem:[%s6389_s15 + $0x2f4] sm:$0xf0]  ;;  %v3925_v5 = vld [vmem:[%s6389_s15 + $0x250] sm:$0xf]  ;;  %v4233_v6 = vld [vmem:[%s6389_s15 + $0x264] sm:$0xf0] }
 0x2ca   : > { %2665 = vmatpush.bf16.msrb.mxu2 %v3626_v12 }
 0x2cd   : > { %2649 = vmatpush.bf16.msrb.mxu3 %v3886_v13  ;;  %v3798_v13 = vor.u32 %v4202_v0, %v3797_v63  ;;  %2678 = vmatpush.bf16.msrb.mxu0 %v3818_v55  ;;  %v3702_v63 = vor.u32 %v4178_v61, %v3701_v60  ;;  %v3703_v0 = vld [vmem:[%s6389_s15 + $0xb0] sm:$0xf0]  ;;  %v4236_v61 = vld [vmem:[%s6389_s15 + $0x284] sm:$0xf] }
 0x2cf   : > { %2684 = vmatpush.bf16.msrb.mxu1 %v3798_v13  ;;  %v3821_v13 = vld [vmem:[%s6389_s15 + $0x188] sm:$0xf] }
 0x2d1   : > { %2650 = vmatpush.bf16.msrb.mxu3 %v3862_v25  ;;  %v3774_v25 = vor.u32 %v4196_v16, %v3773_v15  ;;  %v4205_v15 = vld [vmem:[%s6389_s15 + $0x18c] sm:$0xf] }
 0x2d3   : > { %2685 = vmatpush.bf16.msrb.mxu1 %v3774_v25  ;;  %v3629_v25 = vld [vmem:[%s6389_s15 + $0x8] sm:$0xf] }
 0x2d5   : > { %2651 = vmatpush.bf16.msrb.mxu3 %v3838_v38  ;;  %v3725_v38 = vld [vmem:[%s6389_s15 + $0xc8] sm:$0xf] }
 0x2d7   : > { %2686 = vmatpush.bf16.msrb.mxu1 %v3750_v59  ;;  %v4248_v59 = vld [vmem:[%s6389_s15 + $0x2e4] sm:$0xf] }
 0x2d9   : > { %2652 = vmatpush.bf16.msrb.mxu3 %v3814_v54  ;;  %v3870_v54 = vor.u32 %v4220_v52, %v3869_v51  ;;  %v3807_v51 = vld [vmem:[%s6389_s15 + $0x178] sm:$0xf0] }
 0x33b   : > { %v1899_v45 = vpop.f32.mrf.mxu1 }
 0x33c   : > { %v1900_v42 = vadd.f32 %v1899_v45, %v5709_v9  ;;  %v3989_v9 = vld [vmem:[%s6389_s15 + $0x2d8] sm:$0xf]  ;;  %v3754_v45 = vor.u32 %v4187_v31, %v3751_v32  ;;  %v1926_v32 = vld [vmem:[#allocation11] sm:$0x3] }
 0x33d   : > { %v3990_v57 = vor.u32 %v4250_v49, %v3989_v9  ;;  %v3726_v9 = vor.u32 %v4184_v39, %v3725_v38  ;;  %v1928_v39 = vperm.slane %v1926_v32, 0 }
 0x33e   : > { %v1907_v50 = vadd.f32 %v4370_v35, %v1900_v42  ;;  %v4232_v35 = vld [vmem:[%s6389_s15 + $0x25c] sm:$0xf0]  ;;  %v3727_v42 = vld [vmem:[%s6389_s15 + $0xe0] sm:$0xf0] }
 0x33f   : > { %2697 = vmatpush.bf16.msra.mxu3 %v3990_v57  ;;  %v3918_v40 = vor.u32 %v4232_v35, %v3917_v34  ;;  %v3730_v49 = vor.u32 %v4181_v41, %v3727_v42  ;;  %2687 = vmatpush.bf16.msrb.mxu1 %v3726_v9  ;;  %v3845_v57 = vld [vmem:[%s6389_s15 + $0x1b8] sm:$0xf]  ;;  %v3997_v35 = vld [vmem:[%s6389_s15 + $0x2e0] sm:$0xf]  ;;  %v3973_v42 = vld [vmem:[%s6389_s15 + $0x2b0] sm:$0xf] }
 0x340   : > { %v1908_v62 = vmax.f32 %v1907_v50, 0.0  ;;  %v3894_v50 = vor.u32 %v4226_v46, %v3893_v44  ;;  %v4245_v44 = vld [vmem:[%s6389_s15 + $0x2c4] sm:$0xf0]  ;;  %v4242_v46 = vld [vmem:[%s6389_s15 + $0x2b4] sm:$0xf] }
 0x341   : > { %v3805_v9 = vld [vmem:[%s6389_s15 + $0x160] sm:$0xf]  ;;  %v3974_v53 = vor.u32 %v4245_v44, %v3973_v42  ;;  %v3978_v7 = vor.u32 %v4242_v46, %v3975_v47  ;;  %v4215_v46 = vld [vmem:[%s6389_s15 + $0x1d4] sm:$0xf0]  ;;  %v4212_v47 = vld [vmem:[%s6389_s15 + $0x1c4] sm:$0xf] }
 0x342   : > { %v1909_v2 = vpack.c.bf16 %v1908_v62, %v1908_v62  ;;  %v4175_v62 = vld [vmem:[%s6389_s15 + $0x9c] sm:$0xf]  ;;  %v3853_v44 = vld [vmem:[%s6389_s15 + $0x1c0] sm:$0xf] }
 0x343   : > { %v1901_v8 = vpop.f32.mrf.mxu1  ;;  %2698 = vmatpush.bf16.msra.mxu3 %v3966_v17  ;;  %v3706_v55 = vor.u32 %v4175_v62, %v3703_v0  ;;  %2688 = vmatpush.bf16.msrb.mxu1 %v3702_v63  ;;  %v3823_v17 = vld [vmem:[%s6389_s15 + $0x1a0] sm:$0xf0]  ;;  %v3951_v62 = vld [vmem:[%s6389_s15 + $0x298] sm:$0xf0] }
 0x344   : > { %2020 = vmatmul.bf16.vlgmr.msra.gmra.mxu2 %v1909_v2  ;;  %2033 = vmatmul.bf16.vlgmr.msra.gmra.mxu0 %v1909_v2  ;;  %v3846_v2 = vor.u32 %v4214_v28, %v3845_v57  ;;  %v4169_v8 = vld [vmem:[%s6389_s15 + $0x6c] sm:$0xf]  ;;  %v3826_v18 = vor.u32 %v4205_v15, %v3823_v17  ;;  %v4197_v28 = vld [vmem:[%s6389_s15 + $0x144] sm:$0xf0]  ;;  %v4191_v15 = vld [vmem:[%s6389_s15 + $0x114] sm:$0xf0] }
 0x345   : > { %2723 = vmatpush.bf16.msra.mxu0 %v3994_v3  ;;  %2710 = vmatpush.bf16.msra.mxu2 %v3802_v14  ;;  %v3847_v3 = vld [vmem:[%s6389_s15 + $0x1d0] sm:$0xf0]  ;;  %v3682_v12 = vor.u32 %v4169_v8, %v3679_v11  ;;  %v4208_v14 = vld [vmem:[%s6389_s15 + $0x19c] sm:$0xf0]  ;;  %v3759_v17 = vld [vmem:[%s6389_s15 + $0x118] sm:$0xf0] }
 0x346   : > { %v3850_v4 = vor.u32 %v4211_v1, %v3847_v3  ;;  %v3822_v16 = vor.u32 %v4208_v14, %v3821_v13  ;;  %v4194_v1 = vld [vmem:[%s6389_s15 + $0x134] sm:$0xf]  ;;  %v3757_v14 = vld [vmem:[%s6389_s15 + $0x100] sm:$0xf] }
 0x347   : > { %2699 = vmatpush.bf16.msra.mxu3 %v3942_v30  ;;  %2689 = vmatpush.bf16.msrb.mxu1 %v3678_v10  ;;  %v3631_v30 = vld [vmem:[%s6389_s15 + $0x20] sm:$0xf0]  ;;  %v4230_v8 = vld [vmem:[%s6389_s15 + $0x254] sm:$0xf]  ;;  %v3927_v10 = vld [vmem:[%s6389_s15 + $0x268] sm:$0xf0] }
 0x348   : > { %v3634_v31 = vor.u32 %v4157_v29, %v3631_v30  ;;  %v4182_v29 = vld [vmem:[%s6389_s15 + $0xd4] sm:$0xf]  ;;  %v3735_v30 = vld [vmem:[%s6389_s15 + $0xe8] sm:$0xf0] }
 0x349   : > { %2724 = vmatpush.bf16.msra.mxu0 %v3970_v20  ;;  %2711 = vmatpush.bf16.msra.mxu2 %v3778_v26  ;;  %v4166_v20 = vld [vmem:[%s6389_s15 + $0x4c] sm:$0xf0]  ;;  %v4160_v26 = vld [vmem:[%s6389_s15 + $0x1c] sm:$0xf0] }
 0x34a   : > { %v3654_v22 = vor.u32 %v4166_v20, %v3653_v19  ;;  %v3630_v27 = vor.u32 %v4160_v26, %v3629_v25  ;;  %v3930_v19 = vor.u32 %v4230_v8, %v3927_v10  ;;  %v3901_v20 = vld [vmem:[%s6389_s15 + $0x220] sm:$0xf]  ;;  %v3733_v26 = vld [vmem:[%s6389_s15 + $0xd0] sm:$0xf]  ;;  %v4161_v8 = vld [vmem:[%s6389_s15 + $0x24] sm:$0xf0] }
 0x34b   : > { %2700 = vmatpush.bf16.msra.mxu3 %v3918_v40  ;;  %v3998_v40 = vor.u32 %v4251_v37, %v3997_v35  ;;  %v4218_v35 = vld [vmem:[%s6389_s15 + $0x1f4] sm:$0xf] }
 0x34c   : > { %2690 = vmatpush.bf16.msrb.mxu1 %v3654_v22  ;;  %v4224_v22 = vld [vmem:[%s6389_s15 + $0x224] sm:$0xf]  ;;  %v4158_v10 = vld [vmem:[%s6389_s15 + $0x14] sm:$0xf] }
 0x34d   : > { %2725 = vmatpush.bf16.msra.mxu0 %v3946_v33  ;;  %2712 = vmatpush.bf16.msra.mxu2 %v3754_v45  ;;  %v1929_v33 = vperm.slane %v1926_v32, 1  ;;  %v3999_v45 = vld [vmem:[%s6389_s15 + $0x2f8] sm:$0xf0]  ;;  %v3906_v32 = vor.u32 %v4224_v22, %v3903_v23 }
 0x34e   : > { %v4002_v41 = vor.u32 %v4248_v59, %v3999_v45  ;;  %v3738_v59 = vor.u32 %v4182_v29, %v3735_v30  ;;  %v3709_v45 = vld [vmem:[%s6389_s15 + $0xa0] sm:$0xf] }
 0x34f   : > { %2701 = vmatpush.bf16.msra.mxu3 %v3894_v50  ;;  %v4203_v50 = vld [vmem:[%s6389_s15 + $0x174] sm:$0xf0] }
 0x350   : > { %2691 = vmatpush.bf16.msrb.mxu1 %v3630_v27  ;;  %v3806_v63 = vor.u32 %v4203_v50, %v3805_v9  ;;  %v4185_v27 = vld [vmem:[%s6389_s15 + $0xe4] sm:$0xf0]  ;;  %v3685_v50 = vld [vmem:[%s6389_s15 + $0x70] sm:$0xf] }
 0x351   : > { %2726 = vmatpush.bf16.msra.mxu0 %v3922_v43  ;;  %2713 = vmatpush.bf16.msra.mxu2 %v3730_v49  ;;  %v3734_v37 = vor.u32 %v4185_v27, %v3733_v26 }
 0x353   : > { %2702 = vmatpush.bf16.msra.mxu3 %v3870_v54  ;;  %v3949_v54 = vld [vmem:[%s6389_s15 + $0x280] sm:$0xf] }
 0x355   : > { %2727 = vmatpush.bf16.msra.mxu0 %v3898_v56  ;;  %2714 = vmatpush.bf16.msra.mxu2 %v3706_v55  ;;  %v4200_v56 = vld [vmem:[%s6389_s15 + $0x164] sm:$0xf]  ;;  %v3781_v55 = vld [vmem:[%s6389_s15 + $0x130] sm:$0xf] }
 0x356   : > { %v3810_v0 = vor.u32 %v4200_v56, %v3807_v51  ;;  %v4173_v56 = vld [vmem:[%s6389_s15 + $0x84] sm:$0xf0]  ;;  %v4170_v51 = vld [vmem:[%s6389_s15 + $0x74] sm:$0xf] }
 0x357   : > { %2703 = vmatpush.bf16.msra.mxu3 %v3846_v2  ;;  %v3783_v2 = vld [vmem:[%s6389_s15 + $0x148] sm:$0xf0] }
 0x358   : > { %v3786_v13 = vor.u32 %v4194_v1, %v3783_v2  ;;  %v3663_v1 = vld [vmem:[%s6389_s15 + $0x58] sm:$0xf0] }
 0x359   : > { %2728 = vmatpush.bf16.msra.mxu0 %v3874_v58  ;;  %2715 = vmatpush.bf16.msra.mxu2 %v3682_v12  ;;  %v4239_v58 = vld [vmem:[%s6389_s15 + $0x294] sm:$0xf0]  ;;  %v3782_v12 = vor.u32 %v4197_v28, %v3781_v55  ;;  %v4164_v28 = vld [vmem:[%s6389_s15 + $0x44] sm:$0xf] }
 0x35a   : > { %v3950_v3 = vor.u32 %v4239_v58, %v3949_v54  ;;  %v3829_v54 = vld [vmem:[%s6389_s15 + $0x190] sm:$0xf]  ;;  %v4209_v58 = vld [vmem:[%s6389_s15 + $0x1a4] sm:$0xf0]  ;;  %v4167_v55 = vld [vmem:[%s6389_s15 + $0x54] sm:$0xf0] }
 0x35b   : > { %2704 = vmatpush.bf16.msra.mxu3 %v3822_v16  ;;  %v4188_v16 = vld [vmem:[%s6389_s15 + $0x104] sm:$0xf]  ;;  %v3830_v2 = vor.u32 %v4209_v58, %v3829_v54 }
 0x35c   : > { %v3762_v25 = vor.u32 %v4188_v16, %v3759_v17 }
 0x35d   : > { %2729 = vmatpush.bf16.msra.mxu0 %v3850_v4  ;;  %2716 = vmatpush.bf16.msra.mxu2 %v3658_v24  ;;  %v3954_v4 = vor.u32 %v4236_v61, %v3951_v62  ;;  %v3758_v24 = vor.u32 %v4191_v15, %v3757_v14  ;;  %v3831_v61 = vld [vmem:[%s6389_s15 + $0x1a8] sm:$0xf0]  ;;  %v3686_v62 = vor.u32 %v4173_v56, %v3685_v50 }
 0x35e   : > { %v2138_v15 = vld [vmem:[#allocation13] sm:$0x3f] }
 0x35f   : > { %v2140_v16 = vperm.slane %v2138_v15, 0  ;;  %v2141_v22 = vperm.slane %v2138_v15, 1  ;;  %v2142_v27 = vperm.slane %v2138_v15, 2 }
 0x361   : > { %2730 = vmatpush.bf16.msra.mxu0 %v3826_v18  ;;  %2717 = vmatpush.bf16.msra.mxu2 %v3634_v31  ;;  %v3926_v18 = vor.u32 %v4233_v6, %v3925_v5  ;;  %v3902_v31 = vor.u32 %v4227_v21, %v3901_v20  ;;  %v3666_v5 = vor.u32 %v4164_v28, %v3663_v1  ;;  %v3637_v6 = vld [vmem:[%s6389_s15 + $0x10] sm:$0xf] }
 0x3c1   : > { %v2034_v34 = vpop.f32.mrf.mxu0 }
 0x3c2   : > { %v2035_v36 = vadd.f32 %v2034_v34, %v1929_v33  ;;  %v3877_v33 = vld [vmem:[%s6389_s15 + $0x1f0] sm:$0xf]  ;;  %v4221_v34 = vld [vmem:[%s6389_s15 + $0x204] sm:$0xf0] }
 0x3c4   : > { %v2039_v38 = vmax.f32 %v2035_v36, 0.0  ;;  %v3879_v36 = vld [vmem:[%s6389_s15 + $0x208] sm:$0xf0] }
 0x3c5   : > { %v3882_v42 = vor.u32 %v4218_v35, %v3879_v36  ;;  %v2143_v35 = vperm.slane %v2138_v15, 3 }
 0x3c6   : > { %v6135_v43 = vpack.c.bf16 %v2039_v38, %v2039_v38  ;;  %v4179_v38 = vld [vmem:[%s6389_s15 + $0xb4] sm:$0xf0] }
 0x3c7   : > { %v2021_v48 = vpop.f32.mrf.mxu2  ;;  %v3710_v9 = vor.u32 %v4179_v38, %v3709_v45 }
 0x3c8   : > { %v2022_v49 = vadd.f32 %v2021_v48, %v1928_v39  ;;  %2653 = vmatmul.bf16.vlgmr.msrb.gmra.mxu3 %v6135_v43  ;;  %2679 = vmatmul.bf16.vlgmr.msrb.gmra.mxu0 %v6135_v43  ;;  %v4176_v39 = vld [vmem:[%s6389_s15 + $0xa4] sm:$0xf]  ;;  %v3855_v48 = vld [vmem:[%s6389_s15 + $0x1d8] sm:$0xf0] }
 0x3c9   : > { %v2036_v52 = vpop.f32.mrf.mxu0  ;;  %2749 = vmatpush.bf16.msrb.mxu3 %v3998_v40  ;;  %2775 = vmatpush.bf16.msrb.mxu0 %v4002_v41  ;;  %v3711_v40 = vld [vmem:[%s6389_s15 + $0xb8] sm:$0xf0]  ;;  %v3878_v41 = vor.u32 %v4221_v34, %v3877_v33 }
 0x3ca   : > { %v2038_v60 = vmax.f32 %v2022_v49, 0.0  ;;  %v3714_v49 = vor.u32 %v4176_v39, %v3711_v40  ;;  %v3687_v52 = vld [vmem:[%s6389_s15 + $0x88] sm:$0xf0]  ;;  %v2144_v40 = vperm.slane %v2138_v15, 4 }
 0x3cc   : > { %v6175_v57 = vpack.c.bf16 %v2038_v60, %v2038_v60  ;;  %v4206_v60 = vld [vmem:[%s6389_s15 + $0x194] sm:$0xf] }
 0x3cd   : > { %2750 = vmatpush.bf16.msrb.mxu3 %v3974_v53  ;;  %2776 = vmatpush.bf16.msrb.mxu0 %v3978_v7  ;;  %v3854_v53 = vor.u32 %v4215_v46, %v3853_v44  ;;  %v3858_v7 = vor.u32 %v4212_v47, %v3855_v48 }
 0x3ce   : > { %2640 = vmatmul.bf16.vlgmr.msra.gmra.mxu1 %v6175_v57  ;;  %2666 = vmatmul.bf16.vlgmr.msrb.gmra.mxu2 %v6175_v57 }
 0x3cf   : > { %v2023_v11 = vpop.f32.mrf.mxu2  ;;  %2736 = vmatpush.bf16.msra.mxu1 %v3806_v63  ;;  %2762 = vmatpush.bf16.msrb.mxu2 %v3810_v0  ;;  %v3690_v63 = vor.u32 %v4170_v51, %v3687_v52  ;;  %v3661_v0 = vld [vmem:[%s6389_s15 + $0x40] sm:$0xf] }
 0x3d0   : > { %v3639_v11 = vld [vmem:[%s6389_s15 + $0x28] sm:$0xf0] }
 0x3d1   : > { %2751 = vmatpush.bf16.msrb.mxu3 %v3950_v3  ;;  %2777 = vmatpush.bf16.msrb.mxu0 %v3954_v4  ;;  %v3834_v3 = vor.u32 %v4206_v60, %v3831_v61  ;;  %v3662_v4 = vor.u32 %v4167_v55, %v3661_v0 }
 0x3d3   : > { %2737 = vmatpush.bf16.msra.mxu1 %v3782_v12  ;;  %2763 = vmatpush.bf16.msrb.mxu2 %v3786_v13  ;;  %v3638_v12 = vor.u32 %v4161_v8, %v3637_v6  ;;  %v3642_v13 = vor.u32 %v4158_v10, %v3639_v11 }
 0x3d5   : > { %2752 = vmatpush.bf16.msrb.mxu3 %v3926_v18  ;;  %2778 = vmatpush.bf16.msrb.mxu0 %v3930_v19 }
 0x3d7   : > { %2738 = vmatpush.bf16.msra.mxu1 %v3758_v24  ;;  %2764 = vmatpush.bf16.msrb.mxu2 %v3762_v25 }
 0x3d8   : > { %2705 = vmatmul.bf16.vlgmr.msra.gmra.mxu3 %v6135_v43  ;;  %2731 = vmatmul.bf16.vlgmr.msra.gmra.mxu0 %v6135_v43 }
 0x3d9   : > { %2753 = vmatpush.bf16.msrb.mxu3 %v3902_v31  ;;  %2779 = vmatpush.bf16.msrb.mxu0 %v3906_v32 }
 0x3db   : > { %2739 = vmatpush.bf16.msra.mxu1 %v3734_v37  ;;  %2765 = vmatpush.bf16.msrb.mxu2 %v3738_v59 }
 0x3dd   : > { %2754 = vmatpush.bf16.msrb.mxu3 %v3878_v41  ;;  %2780 = vmatpush.bf16.msrb.mxu0 %v3882_v42 }
 0x3de   : > { %2692 = vmatmul.bf16.vlgmr.msrb.gmra.mxu1 %v6175_v57  ;;  %2718 = vmatmul.bf16.vlgmr.msra.gmra.mxu2 %v6175_v57 }
 0x3df   : > { %2740 = vmatpush.bf16.msra.mxu1 %v3710_v9  ;;  %2766 = vmatpush.bf16.msrb.mxu2 %v3714_v49  ;;  %v2145_v9 = vperm.slane %v2138_v15, 5 }
 0x3e1   : > { %2755 = vmatpush.bf16.msrb.mxu3 %v3854_v53  ;;  %2781 = vmatpush.bf16.msrb.mxu0 %v3858_v7 }
 0x3e3   : > { %2741 = vmatpush.bf16.msra.mxu1 %v3686_v62  ;;  %2767 = vmatpush.bf16.msrb.mxu2 %v3690_v63 }
 0x3e5   : > { %2756 = vmatpush.bf16.msrb.mxu3 %v3830_v2  ;;  %2782 = vmatpush.bf16.msrb.mxu0 %v3834_v3 }
 0x3e7   : > { %2742 = vmatpush.bf16.msra.mxu1 %v3662_v4  ;;  %2768 = vmatpush.bf16.msrb.mxu2 %v3666_v5 }
 0x3e8   : > { %2757 = vmatmul.bf16.vlgmr.msrb.gmra.mxu3 %v6135_v43  ;;  %2783 = vmatmul.bf16.vlgmr.msrb.gmra.mxu0 %v6135_v43 }
 0x3eb   : > { %2743 = vmatpush.bf16.msra.mxu1 %v3638_v12  ;;  %2769 = vmatpush.bf16.msrb.mxu2 %v3642_v13 }
 0x3ee   : > { %2744 = vmatmul.bf16.vlgmr.msra.gmra.mxu1 %v6175_v57  ;;  %2770 = vmatmul.bf16.vlgmr.msrb.gmra.mxu2 %v6175_v57 }
 0x445   : > { %v2680_v14 = vpop.f32.mrf.mxu0 }
 0x44b   : > { %v2641_v17 = vpop.f32.mrf.mxu1  ;;  %v2654_v18 = vpop.f32.mrf.mxu3 }
 0x44c   : > { %v2642_v19 = vadd.f32 %v2641_v17, %v2140_v16 }
 0x44d   : > { %v2682_v20 = vpop.f32.mrf.mxu0 }
 0x44e   : > { %v2655_v21 = vadd.f32 %v2654_v18, %v2642_v19 }
 0x450   : > { %2788 = vst [vmem:[%s6331_s17] sm:$0xff] %v2655_v21 }
 0x451   : > { %v2667_v43 = vpop.f32.mrf.mxu2 }
 0x452   : > { %v2668_v57 = vadd.f32 %v2667_v43, %v2141_v22 }
 0x453   : > { %v2643_v23 = vpop.f32.mrf.mxu1  ;;  %v2656_v24 = vpop.f32.mrf.mxu3 }
 0x454   : > { %v2681_v25 = vadd.f32 %v2680_v14, %v2668_v57 }
 0x455   : > { %v2732_v26 = vpop.f32.mrf.mxu0 }
 0x456   : > { %2789 = vst [vmem:[%s6331_s17 + $0x8] sm:$0xff] %v2681_v25 }
 0x459   : > { %v2669_v29 = vpop.f32.mrf.mxu2 }
 0x45b   : > { %v2693_v30 = vpop.f32.mrf.mxu1  ;;  %v2706_v31 = vpop.f32.mrf.mxu3 }
 0x45c   : > { %v2694_v32 = vadd.f32 %v2693_v30, %v2142_v27 }
 0x45d   : > { %v2734_v33 = vpop.f32.mrf.mxu0 }
 0x45e   : > { %v2707_v34 = vadd.f32 %v2706_v31, %v2694_v32 }
 0x460   : > { %2790 = vst [vmem:[%s6331_s17 + $0x10] sm:$0xff] %v2707_v34 }
 0x461   : > { %v2719_v36 = vpop.f32.mrf.mxu2 }
 0x462   : > { %v2720_v37 = vadd.f32 %v2719_v36, %v2143_v35 }
 0x463   : > { %v2695_v59 = vpop.f32.mrf.mxu1  ;;  %v2708_v45 = vpop.f32.mrf.mxu3 }
 0x464   : > { %v2733_v38 = vadd.f32 %v2732_v26, %v2720_v37 }
 0x465   : > { %v2784_v39 = vpop.f32.mrf.mxu0 }
 0x466   : > { %2791 = vst [vmem:[%s6331_s17 + $0x18] sm:$0xff] %v2733_v38 }
 0x469   : > { %v2721_v41 = vpop.f32.mrf.mxu2 }
 0x46b   : > { %v2745_v42 = vpop.f32.mrf.mxu1  ;;  %v2758_v44 = vpop.f32.mrf.mxu3 }
 0x46c   : > { %v2746_v46 = vadd.f32 %v2745_v42, %v2144_v40 }
 0x46d   : > { %v2786_v47 = vpop.f32.mrf.mxu0 }
 0x46e   : > { %v2759_v48 = vadd.f32 %v2758_v44, %v2746_v46 }
 0x470   : > { %2792 = vst [vmem:[%s6331_s17 + $0x20] sm:$0xff] %v2759_v48 }
 0x471   : > { %v2771_v49 = vpop.f32.mrf.mxu2 }
 0x472   : > { %v2772_v50 = vadd.f32 %v2771_v49, %v2145_v9 }
 0x473   : > { %v2747_v56 = vpop.f32.mrf.mxu1  ;;  %v2760_v51 = vpop.f32.mrf.mxu3 }
 0x474   : > { %v2785_v52 = vadd.f32 %v2784_v39, %v2772_v50 }
 0x476   : > { %2793 = vst.msk [vmem:[%s6331_s17 + $0x28] sm:$0xff] %vm1246_vm0, %v2785_v52 }
 0x477   : > { %4610 = shalt.err (!%p4607_p8)
}
 0x478   : > { %4283 = dma.vmem_to_hbm [thread:$0]  (%p4806_p5), %s2813_s23, 768, %s2815_s7, %s2795_s0  }
 0x479   : > { %v2773_v53 = vpop.f32.mrf.mxu2 }
 0x47a PF: > { %s6426_s27 = sld [smem:[#allocation22_spill]] }
 0x47b   : > { %s6427_s17 = sld [smem:[#allocation20_spill]] }
 0x480   : > { %p4325_p9 = scmp.ge.s32.totalorder %s6426_s27, 2 }
 0x481   : > { %s2829_s29 = sand.u32 1, %s6427_s17  }
 0x482   : > { %p4308_p10 = pnand %p4325_p9, %p4810_p6  ;;  %s2830_s30 = scalar_lea.sflag [#allocation4], %s2829_s29 }
 0x484   : > { %p4309_p11 = pneg %p4308_p10 }
 0x486   : > { %4644 = dma.done.wait (%p4309_p11), %s2830_s30, 768  }
 0x487   : > { %4646 = vsyncadd (%p4309_p11), %s2830_s30, 4294966528  ;;  %s6429_s30 = sld [smem:[#allocation23_spill]]  ;;  %s6432_s27 = smov %s4653_s28 }
 0x488   : > { %s6430_s25 = sld [smem:[#allocation21_spill]] }
 0x489   : > { %s6431_s29 = sld [smem:[#allocation24_spill]] }
 0x48d   : > { %p33_p12 = scmp.ge.s32.totalorder %s6429_s30, 6  }
 0x48e   : > { %s6433_s28 = smov %s6430_s25 }
 0x48f   :  { %35 = sbr.rel (!%p33_p12) target bundleno = 14 (0xe), region = 170 }
 0x494   :  { %2843 = vsyncpa [#allocation3], 1 }
 0x495   :  { %2845 = vsyncpa [#allocation3 + $0x1], 1 }
 0x496   :  { %2846 = vsyncpa [#allocation6], 1 }
 0x497   :  { %2847 = vsyncpa [#allocation9], 1 }
 0x498   :  { %2848 = vsyncpa [#allocation12], 1 }
 0x499   :  { %2849 = vsyncpa [#allocation4], 1 }
 0x49a   :  { %2851 = vsyncpa [#allocation4 + $0x1], 1 }

</bundles_post_ra>
